<compile_context>
chip_gen: v6e
topology: v6e:2x2x1
jax: 0.10.0
libtpu: 0.0.40
codegen_flags: <defaults>
</compile_context>

<pallas_src>
import functools

import jax
import jax.numpy as jnp
from jax import lax
from jax.experimental import pallas as pl
from jax.experimental.pallas import tpu as pltpu


# ----------------------------------------------------------------------------
# Portable, grid-invariant dropout mask: lowbias32-style integer hash.
# ----------------------------------------------------------------------------
def _as_i32(v):
    """Reinterpret an unsigned 32-bit constant as the equivalent signed int."""
    return v - (1 << 32) if v >= (1 << 31) else v


_MIX1 = _as_i32(0x7FEB352D)
_MIX2 = _as_i32(0x846CA68B)
_GOLD = _as_i32(0x9E3779B9)


def _shr(x, n):
    """Logical (zero-fill) right shift on int32 bit patterns."""
    return lax.shift_right_logical(x, jnp.full_like(x, n))


def _hash32(idx, seed):
    """32-bit integer hash of (global element index, seed). Bit-exact on CPU/TPU."""
    h = idx + seed * jnp.int32(_GOLD)
    h = h ^ _shr(h, 16)
    h = h * jnp.int32(_MIX1)
    h = h ^ _shr(h, 15)
    h = h * jnp.int32(_MIX2)
    h = h ^ _shr(h, 16)
    return h


def _keep_mask(idx, seed, p):
    """Bernoulli(1-p) keep mask via an integer-threshold compare on 24 bits."""
    thresh = int(round(float(p) * float(1 << 24)))
    u24 = _hash32(idx, seed) & 0xFFFFFF          # non-negative 24-bit uniform
    return u24 >= thresh


def _round_up(x, m):
    return (x + m - 1) // m * m


# ----------------------------------------------------------------------------
# Kernel
# ----------------------------------------------------------------------------
def weight_drop_linear_kernel(seed_ref, x_ref, wt_ref, b_ref, o_ref, *, p, n_cols):
    """seed_ref: SMEM (1,) i32; x_ref: (tm, tk); wt_ref: (tk, tn) = W^T tile;
    b_ref: (1, tn); o_ref: (tm, tn) f32 — resident across the K axis (accumulator)."""
    k = pl.program_id(2)
    nk = pl.num_programs(2)

    @pl.when(k == 0)
    def _init():
        o_ref[...] = jnp.zeros_like(o_ref)

    wt = wt_ref[...]
    if p > 0.0:
        # Dropout mask from the *global* (row, col) of this W^T tile, so the
        # mask is identical for every batch block i that reuses this tile.
        # (Regenerating it per i-block is redundant VPU work but free filler
        # while the MXU is busy; restructure only if VALU-bound.)
        tk, tn = wt.shape
        j = pl.program_id(1)
        row = k * tk + lax.broadcasted_iota(jnp.int32, (tk, tn), 0)
        col = j * tn + lax.broadcasted_iota(jnp.int32, (tk, tn), 1)
        keep = _keep_mask(row * n_cols + col, seed_ref[0], p)
        wt = jnp.where(keep, wt, 0.0)

    # MXU: (tm, tk) x (tk, tn) with lane-dense output (no transposed RHS).
    o_ref[...] += jnp.dot(x_ref[...], wt, preferred_element_type=jnp.float32)

    @pl.when(k == nk - 1)
    def _finalize():
        scale = 1.0 / (1.0 - p) if p > 0.0 else 1.0
        # Fold the dropout 1/(1-p) scale here (tm*tn mults once per (i, j)
        # instead of N*K mults on the weight); then add the bias.
        o_ref[...] = o_ref[...] * scale + b_ref[...]


# ----------------------------------------------------------------------------
# Wrapper
# ----------------------------------------------------------------------------
def weight_drop_linear(x, w_raw, b, seed, p, *, tm=256, tn=512, tk=512):
    """y = x @ dropout(w_raw, p).T + b   (WeightDrop-wrapped nn.Linear, training)."""
    B, K = x.shape
    N, K2 = w_raw.shape
    assert K == K2, "in_features mismatch"
    assert 0.0 <= float(p) < 1.0, "dropout p must be in [0, 1)"
    b2 = b.reshape(1, N)

    # Layout plumbing (wrapper side): feed the MXU a [K, N] RHS so the output
    # N dimension stays on the lane axis and no in-kernel transpose is needed.
    w_t = w_raw.T

    # Tile sizes: (8, 128)-aligned, clipped to the (rounded-up) problem size.
    tm = min(tm, _round_up(B, 8))
    tk = min(tk, _round_up(K, 128))
    tn = min(tn, _round_up(N, 128))

    Bp, Kp, Np = _round_up(B, tm), _round_up(K, tk), _round_up(N, tn)
    xf = jnp.pad(x.astype(jnp.float32), ((0, Bp - B), (0, Kp - K)))
    wf = jnp.pad(w_t.astype(jnp.float32), ((0, Kp - K), (0, Np - N)))
    bf = jnp.pad(b2.astype(jnp.float32), ((0, 0), (0, Np - N)))

    grid = (Bp // tm, Np // tn, Kp // tk)   # K last ("arbitrary", innermost)

    kernel = functools.partial(weight_drop_linear_kernel, p=float(p), n_cols=Np)
    cost = pl.CostEstimate(
        flops=2 * Bp * Np * Kp,
        transcendentals=0,
        bytes_accessed=4 * (Bp * Kp + Kp * Np + Bp * Np + Np),
    )

    out = pl.pallas_call(
        kernel,
        out_shape=jax.ShapeDtypeStruct((Bp, Np), jnp.float32),
        grid=grid,
        in_specs=[
            pl.BlockSpec(memory_space=pltpu.SMEM),              # seed scalar
            pl.BlockSpec((tm, tk), lambda i, j, k: (i, k)),      # x tile
            pl.BlockSpec((tk, tn), lambda i, j, k: (k, j)),      # W^T tile
            pl.BlockSpec((1, tn), lambda i, j, k: (0, j)),       # bias tile
        ],
        out_specs=pl.BlockSpec((tm, tn), lambda i, j, k: (i, j)),
        compiler_params=pltpu.CompilerParams(
            dimension_semantics=("parallel", "parallel", "arbitrary"),
            vmem_limit_bytes=48 * 1024 * 1024,
        ),
        cost_estimate=cost,
    )(seed, xf, wf, bf)

    return out[:B, :N]


# ----------------------------------------------------------------------------
# Demo / self-check
# ----------------------------------------------------------------------------
if __name__ == "__main__":
    key = jax.random.PRNGKey(0)
    k_x, k_w, k_b = jax.random.split(key, 3)

    # Small-but-tiled shapes: nn.Linear(512, 512), batch 256; tiles give a
    # (2, 2, 2) grid so the accumulator / pipelining path is exercised.
    B, K, N = 256, 512, 512
    p = 0.5  # WeightDrop(module, ['weight'], dropout=0.5)

    x = jax.random.normal(k_x, (B, K), dtype=jnp.float32)
    weight_raw = 0.1 * jax.random.normal(k_w, (N, K), dtype=jnp.float32)  # 'weight_raw'
    bias = 0.1 * jax.random.normal(k_b, (N,), dtype=jnp.float32)
    seed = jnp.array([42], dtype=jnp.int32)

    y = weight_drop_linear(x, weight_raw, bias, seed, p, tm=128, tn=256, tk=256)
    jax.block_until_ready(y)
    assert y.shape == (B, N) and y.dtype == jnp.float32

    # Pure-JAX reference using the same deterministic hash mask.
    row = jnp.arange(K, dtype=jnp.int32)[:, None]
    col = jnp.arange(N, dtype=jnp.int32)[None, :]
    keep = _keep_mask(row * N + col, seed[0], p)                 # mask on W^T layout
    w_masked_t = jnp.where(keep, weight_raw.T, 0.0) * (1.0 / (1.0 - p))
    y_ref = x @ w_masked_t + bias[None, :]

    max_err = float(jnp.max(jnp.abs(y - y_ref)))
    assert max_err < 5e-2, f"mismatch vs reference: max abs err = {max_err}"

    print("KERNEL_OK")
</pallas_src>

<mosaic_0001>
module attributes {stable_mosaic.version = 11 : i64} {
  func.func @weight_drop_linear_kernel(%arg0: i32, %arg1: i32, %arg2: i32, %arg3: memref<1xi32, #tpu.memory_space<smem>>, %arg4: memref<128x256xf32, #tpu.memory_space<vmem>>, %arg5: memref<256x256xf32, #tpu.memory_space<vmem>>, %arg6: memref<1x256xf32, #tpu.memory_space<vmem>>, %arg7: memref<128x256xf32, #tpu.memory_space<vmem>>) attributes {dimension_semantics = [#tpu.dimension_semantics<parallel>, #tpu.dimension_semantics<parallel>, #tpu.dimension_semantics<arbitrary>], iteration_bounds = array<i64: 2, 2, 2>, scalar_prefetch = 0 : i64, scratch_operands = 0 : i64, tpu.core_type = #tpu.core_type<tc>, window_params = [{transform_indices = @transform_0, window_bounds = array<i64: 1>}, {transform_indices = @transform_1, window_bounds = array<i64: 128, 256>}, {transform_indices = @transform_2, window_bounds = array<i64: 256, 256>}, {transform_indices = @transform_3, window_bounds = array<i64: 1, 256>}, {transform_indices = @transform_4, window_bounds = array<i64: 128, 256>}]} {
    %c0_i32 = arith.constant 0 : i32
    %0 = arith.cmpi eq, %arg2, %c0_i32 : i32
    %1 = arith.extui %0 : i1 to i32
    %c0_i32_0 = arith.constant 0 : i32
    %2 = arith.cmpi ne, %1, %c0_i32_0 : i32
    scf.if %2 {
      %cst_13 = arith.constant 0.000000e+00 : f32
      %46 = vector.broadcast %cst_13 : f32 to vector<128x256xf32>
      %c0_14 = arith.constant 0 : index
      %c0_15 = arith.constant 0 : index
      %47 = vector.load %arg7[%c0_14, %c0_15] : memref<128x256xf32, #tpu.memory_space<vmem>>, vector<128x256xf32>
      tpu.vector_store %arg7[%c0_14, %c0_15], %46 {strides = array<i32>} : memref<128x256xf32, #tpu.memory_space<vmem>>, vector<128x256xf32>,
    } else {
    }
    %c0 = arith.constant 0 : index
    %c0_1 = arith.constant 0 : index
    %3 = vector.load %arg5[%c0, %c0_1] : memref<256x256xf32, #tpu.memory_space<vmem>>, vector<256x256xf32>
    %c256_i32 = arith.constant 256 : i32
    %4 = arith.muli %arg2, %c256_i32 : i32
    %5 = tpu.iota {dimensions = array<i32: 0>} : vector<256x256xi32>
    %6 = vector.broadcast %4 : i32 to vector<256x256xi32>
    %7 = arith.addi %6, %5 : vector<256x256xi32>
    %c256_i32_2 = arith.constant 256 : i32
    %8 = arith.muli %arg1, %c256_i32_2 : i32
    %9 = tpu.iota {dimensions = array<i32: 1>} : vector<256x256xi32>
    %10 = vector.broadcast %8 : i32 to vector<256x256xi32>
    %11 = arith.addi %10, %9 : vector<256x256xi32>
    %c512_i32 = arith.constant 512 : i32
    %12 = vector.broadcast %c512_i32 : i32 to vector<256x256xi32>
    %13 = arith.muli %7, %12 : vector<256x256xi32>
    %14 = arith.addi %13, %11 : vector<256x256xi32>
    %c0_3 = arith.constant 0 : index
    %15 = memref.load %arg3[%c0_3] : memref<1xi32, #tpu.memory_space<smem>>
    %c-1640531527_i32 = arith.constant -1640531527 : i32
    %16 = arith.muli %15, %c-1640531527_i32 : i32
    %17 = vector.broadcast %16 : i32 to vector<256x256xi32>
    %18 = arith.addi %14, %17 : vector<256x256xi32>
    %c16_i32 = arith.constant 16 : i32
    %19 = vector.broadcast %c16_i32 : i32 to vector<256x256xi32>
    %20 = arith.shrui %18, %19 : vector<256x256xi32>
    %21 = arith.xori %18, %20 : vector<256x256xi32>
    %c2146121005_i32 = arith.constant 2146121005 : i32
    %22 = vector.broadcast %c2146121005_i32 : i32 to vector<256x256xi32>
    %23 = arith.muli %21, %22 : vector<256x256xi32>
    %c15_i32 = arith.constant 15 : i32
    %24 = vector.broadcast %c15_i32 : i32 to vector<256x256xi32>
    %25 = arith.shrui %23, %24 : vector<256x256xi32>
    %26 = arith.xori %23, %25 : vector<256x256xi32>
    %c-2073254261_i32 = arith.constant -2073254261 : i32
    %27 = vector.broadcast %c-2073254261_i32 : i32 to vector<256x256xi32>
    %28 = arith.muli %26, %27 : vector<256x256xi32>
    %c16_i32_4 = arith.constant 16 : i32
    %29 = vector.broadcast %c16_i32_4 : i32 to vector<256x256xi32>
    %30 = arith.shrui %28, %29 : vector<256x256xi32>
    %31 = arith.xori %28, %30 : vector<256x256xi32>
    %c16777215_i32 = arith.constant 16777215 : i32
    %32 = vector.broadcast %c16777215_i32 : i32 to vector<256x256xi32>
    %33 = arith.andi %31, %32 : vector<256x256xi32>
    %c8388608_i32 = arith.constant 8388608 : i32
    %34 = vector.broadcast %c8388608_i32 : i32 to vector<256x256xi32>
    %35 = arith.cmpi sge, %33, %34 : vector<256x256xi32>
    %cst = arith.constant 0.000000e+00 : f32
    %36 = vector.broadcast %cst : f32 to vector<256x256xf32>
    %37 = arith.select %35, %3, %36 : vector<256x256xi1>, vector<256x256xf32>
    %c0_5 = arith.constant 0 : index
    %c0_6 = arith.constant 0 : index
    %38 = vector.load %arg7[%c0_5, %c0_6] : memref<128x256xf32, #tpu.memory_space<vmem>>, vector<128x256xf32>
    %c0_7 = arith.constant 0 : index
    %c0_8 = arith.constant 0 : index
    %39 = vector.load %arg4[%c0_7, %c0_8] : memref<128x256xf32, #tpu.memory_space<vmem>>, vector<128x256xf32>
    %cst_9 = arith.constant dense<0.000000e+00> : vector<128x256xf32>
    %40 = tpu.matmul %39, %37, %cst_9 {dimension_numbers = #tpu.dot_dimension_numbers<[1], [0], [0], [1], [0, 0, 1, 1], [], []>} : vector<128x256xf32>, vector<256x256xf32>, vector<128x256xf32> -> vector<128x256xf32>
    %41 = arith.addf %38, %40 : vector<128x256xf32>
    %c0_10 = arith.constant 0 : index
    %c0_11 = arith.constant 0 : index
    %42 = vector.load %arg7[%c0_10, %c0_11] : memref<128x256xf32, #tpu.memory_space<vmem>>, vector<128x256xf32>
    tpu.vector_store %arg7[%c0_10, %c0_11], %41 {strides = array<i32>} : memref<128x256xf32, #tpu.memory_space<vmem>>, vector<128x256xf32>,
    %c1_i32 = arith.constant 1 : i32
    %43 = arith.cmpi eq, %arg2, %c1_i32 : i32
    %44 = arith.extui %43 : i1 to i32
    %c0_i32_12 = arith.constant 0 : i32
    %45 = arith.cmpi ne, %44, %c0_i32_12 : i32
    scf.if %45 {
      %c0_13 = arith.constant 0 : index
      %c0_14 = arith.constant 0 : index
      %46 = vector.load %arg7[%c0_13, %c0_14] : memref<128x256xf32, #tpu.memory_space<vmem>>, vector<128x256xf32>
      %cst_15 = arith.constant 2.000000e+00 : f32
      %47 = vector.broadcast %cst_15 : f32 to vector<128x256xf32>
      %48 = arith.mulf %46, %47 : vector<128x256xf32>
      %c0_16 = arith.constant 0 : index
      %c0_17 = arith.constant 0 : index
      %49 = vector.load %arg6[%c0_16, %c0_17] : memref<1x256xf32, #tpu.memory_space<vmem>>, vector<1x256xf32>
      %50 = vector.broadcast %49 : vector<1x256xf32> to vector<128x256xf32>
      %51 = arith.addf %48, %50 : vector<128x256xf32>
      %c0_18 = arith.constant 0 : index
      %c0_19 = arith.constant 0 : index
      %52 = vector.load %arg7[%c0_18, %c0_19] : memref<128x256xf32, #tpu.memory_space<vmem>>, vector<128x256xf32>
      tpu.vector_store %arg7[%c0_18, %c0_19], %51 {strides = array<i32>} : memref<128x256xf32, #tpu.memory_space<vmem>>, vector<128x256xf32>,
    } else {
    }
    return
  }
  func.func @transform_0(%arg0: i32, %arg1: i32, %arg2: i32) -> i32 {
    %c0_i32 = arith.constant 0 : i32
    %c0_i32_0 = arith.constant 0 : i32
    return %c0_i32 : i32
  }
  func.func @transform_1(%arg0: i32, %arg1: i32, %arg2: i32) -> (i32, i32) {
    %c0_i32 = arith.constant 0 : i32
    return %arg0, %arg2 : i32, i32
  }
  func.func @transform_2(%arg0: i32, %arg1: i32, %arg2: i32) -> (i32, i32) {
    %c0_i32 = arith.constant 0 : i32
    return %arg2, %arg1 : i32, i32
  }
  func.func @transform_3(%arg0: i32, %arg1: i32, %arg2: i32) -> (i32, i32) {
    %c0_i32 = arith.constant 0 : i32
    %c0_i32_0 = arith.constant 0 : i32
    return %c0_i32, %arg1 : i32, i32
  }
  func.func @transform_4(%arg0: i32, %arg1: i32, %arg2: i32) -> (i32, i32) {
    %c0_i32 = arith.constant 0 : i32
    return %arg0, %arg1 : i32, i32
  }
}

</mosaic_0001>

<bundles_post_ra>
// kernel: tpu_custom_call.1
= control target key start
LH: loop header
LB: loop body
LE: loop exit
PB: predicated region body
PF: predicated region fallthrough
CT: control target
= control target key end

     0   :  { %s3546_s0 = inlined_call_operand.<no memory space> [shape: s32[1], index: 0, kind: input, shape index: {}]   ;;  %s3547_s1 = inlined_call_operand.hbm [shape: f32[256,512], index: 1, kind: input, shape index: {}]   ;;  %s3548_s2 = inlined_call_operand.hbm [shape: f32[512,512], index: 2, kind: input, shape index: {}]   ;;  %s3549_s3 = inlined_call_operand.vmem [shape: f32[1,512], index: 3, kind: input, shape index: {}]   ;;  %s3550_s4 = inlined_call_operand.hbm [shape: f32[256,512], index: 4, kind: output, shape index: {}]  }
   0x1   :  { %3566 = sst [smem:[#allocation22_spill]] %s3547_s1 }
   0x2   :  { %3567 = sst [smem:[#allocation23_spill]] %s3548_s2 }
   0x3   :  { %3568 = sst [smem:[#allocation24_spill]] %s3549_s3 }
   0x4   :  { %3569 = sst [smem:[#allocation25_spill]] %s3550_s4 }
   0x5   :  { %9 = sst [smem:[#allocation2]] %s3546_s0 }
   0x6   :  { %10 = vsyncpa [#allocation4], 0 }
   0x7   :  { %12 = vsyncpa [#allocation4 + $0x1], 0 }
   0x8   :  { %13 = vsyncpa [#allocation7], 0 }
   0x9   :  { %15 = vsyncpa [#allocation7 + $0x1], 0 }
   0xa   :  { %16 = vsyncpa [#allocation5], 0 }
   0xb   :  { %18 = vsyncpa [#allocation5 + $0x1], 0  ;;  %s2510_s17 = smov 0   ;;  %s2512_s18 = smov 0  }
   0xc   :  { %s2514_s19 = smov 0   ;;  %s2516_s20 = smov 0  }
   0xd   :  { %s2518_s21 = smov 0   ;;  %s2520_s22 = smov 0  }
   0xe   :  { %s2522_s23 = smov 0   ;;  %s2524_s0 = smov 0  }
   0xf   :  { %s2526_s24 = smov 0   ;;  %s2528_s25 = smov 0  }
  0x10   :  { %s2530_s26 = smov 0   ;;  %s2532_s27 = smov 0  }
  0x11   :  { %s2534_s28 = smov 0   ;;  %s2536_s29 = smov 0  }
  0x12   :  { %s2538_s30 = smov 0   ;;  %s2540_s5 = smov 0  }
  0x13 LB: > { %3570 = sst [smem:[#allocation12_spill]] %s2438_s0  ;;  %s1935_s6 = sadd.s32 4294967295, %s2470_s5   ;;  %s2470_s5 = sphi %s2540_s5, %s24_s5   ;;  %s2466_s30 = sphi %s2538_s30, %s3645_s30   ;;  %s2462_s29 = sphi %s2536_s29, %s3644_s29   ;;  %s2458_s28 = sphi %s2534_s28, %s3657_s28   ;;  %s2454_s27 = sphi %s2532_s27, %s3656_s27   ;;  %s2450_s26 = sphi %s2530_s26, %s3655_s26   ;;  %s2446_s25 = sphi %s2528_s25, %s3654_s25   ;;  %s2442_s24 = sphi %s2526_s24, %s3653_s24   ;;  %s2438_s0 = sphi %s2524_s0, %s3652_s0   ;;  %s2434_s23 = sphi %s2522_s23, %s3640_s23   ;;  %s2430_s22 = sphi %s2520_s22, %s3651_s22   ;;  %s2426_s21 = sphi %s2518_s21, %s3650_s21   ;;  %s2422_s20 = sphi %s2516_s20, %s3649_s20   ;;  %s2418_s19 = sphi %s2514_s19, %s3648_s19   ;;  %s2414_s18 = sphi %s2512_s18, %s3647_s18   ;;  %s2410_s17 = sphi %s2510_s17, %s3646_s17  }
  0x14   : > { %3571 = sst [smem:[#allocation13_spill]] %s2446_s25  ;;  %s36_s7 = sadd.s32 1, %s2458_s28 }
  0x15   : > { %3572 = sst [smem:[#allocation14_spill]] %s2450_s26  ;;  %p2590_p0 = scmp.ge.s32.totalorder %s36_s7, 2 }
  0x16   : > { %3573 = sst [smem:[#allocation15_spill]] %s2454_s27  ;;  %p80_p1 = scmp.ne.s32.totalorder %s2442_s24, %s2438_s0 }
  0x17   : > { %3574 = sst [smem:[#allocation16_spill]] %s2462_s29  ;;  %s3659_s7 = smov (%p2590_p0, %s36_s7), 0 }
  0x18   : > { %3575 = sst [smem:[#allocation17_spill]] %s2466_s30  ;;  %p3558_p2 = scmp.eq.s32.totalorder %s2470_s5, 0 }
  0x19   : > { %3577 = sst [smem:[#allocation18_spill]] %s3659_s7  ;;  %p86_p3 = scmp.ne.s32.totalorder %s2438_s0, %s2434_s23 }
  0x1a   : > { %s2606_s11 = ssub.s32 %s2458_s28, %s3659_s7  ;;  %p2608_p4 = scmp.eq.s32.totalorder %s1935_s6, 0 }
  0x1b   : > { %p2614_p5 = por %p3558_p2, %p80_p1  ;;  %p2618_p6 = scmp.eq.s32.totalorder %s1935_s6, 7 }
  0x1c   : > { %p2624_p7 = por %p2608_p4, %p86_p3  ;;  %p3557_p8 = scmp.lt.s32.totalorder %s2470_s5, 8 }
  0x1d   : > { %s195_s16 = sand.u32 1, %s2442_s24   ;;  %s1941_s10 = sshll.u32 %s2458_s28, 1 }
  0x1e   : > { %s3581_s15 = scalar_select %p2624_p7, 1, 0 }
  0x1f   : > { %s1939_s23 = sshll.u32 %s195_s16, 8  ;;  %s2029_s9 = sshll.u32 %s2466_s30, 6 }
  0x20   : > { %3582 = sst [smem:[#allocation19_spill]] %s3581_s15  ;;  %s199_s7 = scalar_lea.vmem [#allocation3], %s1939_s23 }
  0x21   : > { %s209_s4 = sshll.u32 %s199_s7, 4  ;;  %s206_s27 = sadd.s32 %s2029_s9, %s1941_s10  ;;  %s210_s4 = int_to_ptr.vmem [resolvable:$true] %s209_s4 }
  0x22   : > { %s1943_s25 = sshll.u32 %s206_s27, 7  ;;  %p2636_p9 = pnand %p3557_p8, %p2614_p5 }
  0x23   : > { %s3584_s1 = sld [smem:[#allocation22_spill]]  ;;  %p1949_p10 = scmp.ge.s32.totalorder %s2470_s5, 1 }
  0x24   : > { %s196_s0 = scalar_lea.sflag [#allocation4], %s195_s16  ;;  %p2252_p11 = pneg %p2636_p9 }
  0x25   : > { %s2263_s23 = scalar_lea.vmem %s210_s4, 4096  ;;  %s2472_s27 = smov [#allocation3]  }
  0x26   : > { %p2264_p12 = scmp.ne.s32.totalorder %s210_s4, %s2263_s23  ;;  %s2268_s7 = sshll.u32 %s2472_s27, 4  ;;  %s2269_s7 = int_to_ptr.vmem [resolvable:$false] %s2268_s7 }
  0x27   : > { %s2270_s9 = scalar_lea.vmem %s2269_s7, 8192  ;;  %p2271_p3 = scmp.lt.s32.totalorder %s210_s4, %s2269_s7 }
  0x28   : > { %p2266_p13 = pnand %p2264_p12, %p2252_p11  ;;  %p2272_p5 = scmp.lt.s32.totalorder %s2270_s9, %s2263_s23 }
  0x29   : > { %s208_s15 = scalar_lea.hbm %s3584_s1, %s1943_s25 }
  0x2a   : > { %p2267_p1 = pneg %p2266_p13  ;;  %p2273_p8 = por %p2272_p5, %p2271_p3 }
  0x2c   : > { %p2274_p2 = pnand %p2273_p8, %p2267_p1 }
  0x2e   : > { %2277 = shalt.err (!%p2274_p2)
}
  0x2f   : > { %s3559_s3 = smov 512   ;;  %s3560_s25 = smov 256  }
  0x30   : > { %s3561_s26 = smov 16   ;;  %p249_p2 = scmp.lt.s32.totalorder %s2470_s5, 9 }
  0x31   : > { %2105 = dma.hbm_to_vmem [thread:$0]  (!%p2636_p9), %s208_s15, 4096, %s210_s4, %s196_s0, %s3559_s3, %s3560_s25, %s3561_s26  }
  0x32   : > { %p2654_p8 = pnand %p1949_p10, %p249_p2  ;;  %s1936_s13 = sadd.s32 4294967294, %s2470_s5  }
  0x33   : > { %s39_s16 = sadd.s32 1, %s2462_s29  ;;  %s101_s6 = sadd.s32 1, %s2430_s22 }
  0x34   : > { %s3661_s16 = smov (!%p2590_p0, %s39_s16), %s2462_s29  ;;  %p108_p11 = scmp.ne.s32.totalorder %s2430_s22, %s2426_s21 }
  0x35   : > { %p41_p12 = scmp.ge.s32.totalorder %s3661_s16, 2  ;;  %p114_p9 = scmp.ne.s32.totalorder %s2426_s21, %s2422_s20 }
  0x36   : > { %p3586_p13 = scmp.eq.s32.totalorder %s2470_s5, 0  ;;  %s155_s0 = sadd.s32 1, %s2418_s19 }
  0x37   : > { %s3663_s16 = smov (%p41_p12, %s3661_s16), 0  ;;  %s3589_s15 = sadd.s32 1, %s2466_s30 }
  0x38   : > { %p2670_p1 = por %p108_p11, %p3586_p13  ;;  %3588 = sst [smem:[#allocation20_spill]] %s3663_s16 }
  0x39   : > { %s3665_s15 = smov (!%p41_p12, %s3589_s15), %s2466_s30  ;;  %s97_s8 = ssub.s32 %s2462_s29, %s3663_s16 }
  0x3a   : > { %p2684_p0 = por %p114_p9, %p2608_p4  ;;  %p45_p10 = scmp.ge.s32.totalorder %s3665_s15, 2 }
  0x3b   : > { %s98_s20 = sor.u32 %s97_s8, %s2606_s11  ;;  %p165_p5 = scmp.ne.s32.totalorder %s2418_s19, %s2414_s18 }
  0x3c   : > { %p99_p3 = scmp.eq.s32.totalorder %s98_s20, 0  ;;  %s3667_s15 = smov (%p45_p10, %s3665_s15), 0 }
  0x3d   : > { %3591 = sst [smem:[#allocation21_spill]] %s3667_s15  ;;  %s68_s12 = ssub.s32 %s2466_s30, %s3667_s15 }
  0x3e   : > { %s2694_s27 = scalar_select %p99_p3, %s2430_s22, %s101_s6  }
  0x3f   : > { %p2700_p2 = por %p2618_p6, %p165_p5  ;;  %s70_s9 = sor.u32 %s2606_s11, %s68_s12 }
  0x40   : > { %s152_s3 = sor.u32 %s97_s8, %s68_s12  ;;  %p71_p4 = scmp.eq.s32.totalorder %s70_s9, 0 }
  0x41   : > { %p153_p11 = scmp.eq.s32.totalorder %s152_s3, 0  ;;  %p171_p12 = scmp.ne.s32.totalorder %s2414_s18, %s2410_s17 }
  0x42   : > { %p172_p9 = scmp.eq.s32.totalorder %s1936_s13, 7  ;;  %s3593_s20 = sadd.s32 1, %s2442_s24 }
  0x43   : > { %s2710_s25 = scalar_select %p71_p4, %s2442_s24, %s3593_s20  }
  0x44   : > { %s2713_s26 = scalar_select %p153_p11, %s2418_s19, %s155_s0  }
  0x45   : > { %p2715_p13 = por %p172_p9, %p171_p12  ;;  %s219_s14 = sand.u32 1, %s2430_s22  }
  0x46   : > { %s1944_s1 = sshll.u32 %s219_s14, 9  ;;  %s1946_s15 = sshll.u32 %s2462_s29, 1 }
  0x47   : > { %s2030_s11 = sshll.u32 %s2458_s28, 7  ;;  %s223_s8 = scalar_lea.vmem [#allocation6], %s1944_s1 }
  0x48   : > { %s233_s12 = sshll.u32 %s223_s8, 4  ;;  %s230_s9 = sadd.s32 %s2030_s11, %s1946_s15  ;;  %s234_s12 = int_to_ptr.vmem [resolvable:$true] %s233_s12 }
  0x49   : > { %s1948_s3 = sshll.u32 %s230_s9, 7  ;;  %p3595_p6 = scmp.lt.s32.totalorder %s2470_s5, 8 }
  0x4a   : > { %s3597_s2 = sld [smem:[#allocation23_spill]]  ;;  %s220_s30 = scalar_lea.sflag [#allocation7], %s219_s14 }
  0x4b   : > { %p2726_p10 = pnand %p3595_p6, %p2670_p1  ;;  %s2291_s29 = scalar_lea.vmem %s234_s12, 8192 }
  0x4c   : > { %p2292_p5 = scmp.ne.s32.totalorder %s234_s12, %s2291_s29  ;;  %s2476_s1 = smov [#allocation6]  }
  0x4d   : > { %p2280_p3 = pneg %p2726_p10  ;;  %s2296_s15 = sshll.u32 %s2476_s1, 4  ;;  %s2297_s15 = int_to_ptr.vmem [resolvable:$false] %s2296_s15 }
  0x4e   : > { %s2298_s4 = scalar_lea.vmem %s2297_s15, 16384  ;;  %p2299_p1 = scmp.lt.s32.totalorder %s234_s12, %s2297_s15 }
  0x4f   : > { %p2294_p4 = pnand %p2292_p5, %p2280_p3  ;;  %p2300_p12 = scmp.lt.s32.totalorder %s2298_s4, %s2291_s29 }
  0x50   : > { %s232_s16 = scalar_lea.hbm %s3597_s2, %s1948_s3 }
  0x51   : > { %p2295_p11 = pneg %p2294_p4  ;;  %p2301_p9 = por %p2300_p12, %p2299_p1 }
  0x53   : > { %p2302_p6 = pnand %p2301_p9, %p2295_p11 }
  0x55   : > { %2305 = shalt.err (!%p2302_p6)
}
  0x56   : > { %s3598_s11 = smov 16   ;;  %s3599_s8 = smov 256  }
  0x57   : > { %s3600_s14 = smov 512   ;;  %253 = sbr.rel (%p2654_p8) target bundleno = 647 (0x287), region = 36 }
  0x58   : > { %2108 = dma.hbm_to_vmem [thread:$0]  (!%p2726_p10), %s232_s16, 8192, %s234_s12, %s220_s30, %s3600_s14, %s3599_s8, %s3598_s11  }
  0x59   : > { %s3601_s9 = sld [smem:[#allocation12_spill]] (!%p2654_p8) }
  0x5f   : > { %s255_s0 = sand.u32 1, %s3601_s9  }
  0x60   : > { %s1950_s20 = sshll.u32 %s255_s0, 8  ;;  %s256_s1 = scalar_lea.sflag [#allocation4], %s255_s0 }
  0x61   : > { %s2743_s2 = scalar_lea.vmem [#allocation3], %s1950_s20 }
  0x62   : > { %2397 = dma.done.wait (%p2624_p7), %s256_s1, 4096  }
  0x63   : > { %2399 = vsyncadd (%p2624_p7), %s256_s1, 4294963200  ;;  %s264_s29 = sand.u32 1, %s2426_s21  }
  0x64   : > { %s1951_s13 = sshll.u32 %s264_s29, 9  ;;  %s265_s30 = scalar_lea.sflag [#allocation7], %s264_s29 }
  0x65   : > { %s2750_s16 = scalar_lea.vmem [#allocation6], %s1951_s13 }
  0x66   : > { %2401 = dma.done.wait (%p2684_p0), %s265_s30, 8192  }
  0x67   : > { %2403 = vsyncadd (%p2684_p0), %s265_s30, 4294959104  ;;  %s3603_s10 = sld [smem:[#allocation14_spill]]  ;;  %s299_s12 = sand.u32 1, %s2414_s18  }
  0x68   : > { %s1952_s4 = sshll.u32 %s299_s12, 8  ;;  %s3604_s9 = sld [smem:[#allocation24_spill]] }
  0x69   : > { %s2770_s23 = scalar_lea.vmem [#allocation8], %s1952_s4  ;;  %s3605_s0 = sld [smem:[#allocation13_spill]] }
  0x6d   : > { %s2758_s15 = sshll.u32 %s3603_s10, 1 }
  0x6e   : > { %p307_p7 = scmp.lt.s32.totalorder %s2758_s15, 3 }
  0x6f   : > { %p1954_p8 = scmp.ne.s32.totalorder %s3605_s0, 0 }
  0x70   : > { %s2764_s11 = scalar_select %p307_p7, %s2758_s15, 3 }
  0x71   : > { %316 = sbr.rel (%p1954_p8) target bundleno = 135 (0x87), region = 48 }
  0x72   : > { %s309_s3 = scalar_lea.vmem %s3604_s9, %s2764_s11 }
  0x76   : > { %v2477_v0 = vmov 0.0  }
  0x77   : > { %317 = vst [vmem:[%s2770_s23] sm:$0xff] %v2477_v0  ;;  %318 = vst [vmem:[%s2770_s23 + $0x8] sm:$0xff] %v2477_v0 }
  0x78   : > { %319 = vst [vmem:[%s2770_s23 + $0x10] sm:$0xff] %v2477_v0  ;;  %320 = vst [vmem:[%s2770_s23 + $0x18] sm:$0xff] %v2477_v0 }
  0x79   : > { %321 = vst [vmem:[%s2770_s23 + $0x20] sm:$0xff] %v2477_v0  ;;  %322 = vst [vmem:[%s2770_s23 + $0x28] sm:$0xff] %v2477_v0 }
  0x7a   : > { %323 = vst [vmem:[%s2770_s23 + $0x30] sm:$0xff] %v2477_v0  ;;  %324 = vst [vmem:[%s2770_s23 + $0x38] sm:$0xff] %v2477_v0 }
  0x7b   : > { %325 = vst [vmem:[%s2770_s23 + $0x40] sm:$0xff] %v2477_v0  ;;  %326 = vst [vmem:[%s2770_s23 + $0x48] sm:$0xff] %v2477_v0 }
  0x7c   : > { %327 = vst [vmem:[%s2770_s23 + $0x50] sm:$0xff] %v2477_v0  ;;  %328 = vst [vmem:[%s2770_s23 + $0x58] sm:$0xff] %v2477_v0 }
  0x7d   : > { %329 = vst [vmem:[%s2770_s23 + $0x60] sm:$0xff] %v2477_v0  ;;  %330 = vst [vmem:[%s2770_s23 + $0x68] sm:$0xff] %v2477_v0 }
  0x7e   : > { %331 = vst [vmem:[%s2770_s23 + $0x70] sm:$0xff] %v2477_v0  ;;  %332 = vst [vmem:[%s2770_s23 + $0x78] sm:$0xff] %v2477_v0 }
  0x7f   : > { %333 = vst [vmem:[%s2770_s23 + $0x80] sm:$0xff] %v2477_v0  ;;  %334 = vst [vmem:[%s2770_s23 + $0x88] sm:$0xff] %v2477_v0 }
  0x80   : > { %335 = vst [vmem:[%s2770_s23 + $0x90] sm:$0xff] %v2477_v0  ;;  %336 = vst [vmem:[%s2770_s23 + $0x98] sm:$0xff] %v2477_v0 }
  0x81   : > { %337 = vst [vmem:[%s2770_s23 + $0xa0] sm:$0xff] %v2477_v0  ;;  %338 = vst [vmem:[%s2770_s23 + $0xa8] sm:$0xff] %v2477_v0 }
  0x82   : > { %339 = vst [vmem:[%s2770_s23 + $0xb0] sm:$0xff] %v2477_v0  ;;  %340 = vst [vmem:[%s2770_s23 + $0xb8] sm:$0xff] %v2477_v0 }
  0x83   : > { %341 = vst [vmem:[%s2770_s23 + $0xc0] sm:$0xff] %v2477_v0  ;;  %342 = vst [vmem:[%s2770_s23 + $0xc8] sm:$0xff] %v2477_v0 }
  0x84   : > { %343 = vst [vmem:[%s2770_s23 + $0xd0] sm:$0xff] %v2477_v0  ;;  %344 = vst [vmem:[%s2770_s23 + $0xd8] sm:$0xff] %v2477_v0 }
  0x85   : > { %345 = vst [vmem:[%s2770_s23 + $0xe0] sm:$0xff] %v2477_v0  ;;  %346 = vst [vmem:[%s2770_s23 + $0xe8] sm:$0xff] %v2477_v0 }
  0x86   : > { %347 = vst [vmem:[%s2770_s23 + $0xf0] sm:$0xff] %v2477_v0  ;;  %348 = vst [vmem:[%s2770_s23 + $0xf8] sm:$0xff] %v2477_v0 }
  0x87 PF: > { %s3606_s20 = sld [smem:[#allocation13_spill]]  ;;  %v414_v1 = vlaneseq }
  0x88   : > { %s3607_s1 = sld [smem:[#allocation14_spill]] }
  0x89   : > { %s583_s30 = sld [smem:[#allocation2]]  ;;  %v2807_v3 = vshrl.u32 %v414_v1, 7  ;;  %v482_v4 = vand.u32 127, %v414_v1 }
  0x8b   : > { %v430_v6 = vadd.s32 120, %v2807_v3  ;;  %v483_v7 = vadd.s32 128, %v482_v4  ;;  %v429_v9 = vadd.s32 112, %v2807_v3  ;;  %v428_v10 = vadd.s32 104, %v2807_v3 }
  0x8c   : > { %v427_v11 = vadd.s32 96, %v2807_v3  ;;  %v426_v12 = vadd.s32 88, %v2807_v3  ;;  %v425_v13 = vadd.s32 80, %v2807_v3  ;;  %v424_v17 = vadd.s32 72, %v2807_v3 }
  0x8d   : > { %s1955_s29 = sshll.u32 %s3606_s20, 8  ;;  %v423_v25 = vadd.s32 64, %v2807_v3  ;;  %v422_v29 = vadd.s32 56, %v2807_v3  ;;  %p2021_p0 = scmp.ne.s32.totalorder %s3606_s20, 1 }
  0x8e   : > { %s1956_s13 = sshll.u32 %s3607_s1, 8  ;;  %v2809_v5 = vstv %s1955_s29 }
  0x8f   : > { %v484_v2 = vstv %s1956_s13  ;;  %v463_v14 = vadd.s32 %v2809_v5, %v430_v6  ;;  %v462_v16 = vadd.s32 %v2809_v5, %v429_v9  ;;  %s584_s10 = smul.u32 2654435769, %s583_s30  ;;  %v461_v18 = vadd.s32 %v2809_v5, %v428_v10 }
  0x90   : > { %v2812_v8 = vadd.s32 %v484_v2, %v482_v4  ;;  %v2820_v15 = vadd.s32 %v484_v2, %v483_v7  ;;  %v460_v19 = vadd.s32 %v2809_v5, %v427_v11  ;;  %v2827_v20 = vadd.s32 %v2809_v5, %v426_v12 }
  0x91   : > { %v2830_v21 = vadd.s32 %v2809_v5, %v425_v13  ;;  %v502_v22 = vmul.u32 512, %v463_v14  ;;  %v501_v23 = vmul.u32 512, %v462_v16  ;;  %v2833_v24 = vadd.s32 %v2809_v5, %v424_v17 }
  0x92   : > { %v2836_v26 = vstv %s584_s10  ;;  %v500_v27 = vmul.u32 512, %v461_v18  ;;  %v499_v28 = vmul.u32 512, %v460_v19  ;;  %v2856_v0 = vadd.s32 %v2809_v5, %v423_v25 }
  0x93   : > { %v550_v30 = vadd.s32 %v502_v22, %v2820_v15  ;;  %v549_v31 = vadd.s32 %v502_v22, %v2812_v8  ;;  %v548_v32 = vadd.s32 %v501_v23, %v2820_v15  ;;  %v547_v33 = vadd.s32 %v501_v23, %v2812_v8 }
  0x94   : > { %v546_v34 = vadd.s32 %v500_v27, %v2820_v15  ;;  %v545_v35 = vadd.s32 %v500_v27, %v2812_v8  ;;  %v544_v36 = vadd.s32 %v499_v28, %v2820_v15  ;;  %v543_v37 = vadd.s32 %v499_v28, %v2812_v8 }
  0x95   : > { %v617_v38 = vadd.s32 %v2836_v26, %v550_v30  ;;  %v616_v39 = vadd.s32 %v2836_v26, %v549_v31  ;;  %v615_v40 = vadd.s32 %v2836_v26, %v548_v32  ;;  %v614_v41 = vadd.s32 %v2836_v26, %v547_v33 }
  0x96   : > { %v613_v42 = vadd.s32 %v2836_v26, %v546_v34  ;;  %v612_v43 = vadd.s32 %v2836_v26, %v545_v35  ;;  %v611_v44 = vadd.s32 %v2836_v26, %v544_v36  ;;  %v610_v45 = vadd.s32 %v2836_v26, %v543_v37 }
  0x97   : > { %v681_v46 = vshrl.u32 %v617_v38, 16  ;;  %v680_v47 = vshrl.u32 %v616_v39, 16  ;;  %v679_v48 = vshrl.u32 %v615_v40, 16  ;;  %v678_v49 = vshrl.u32 %v614_v41, 16 }
  0x98   : > { %v677_v50 = vshrl.u32 %v613_v42, 16  ;;  %v676_v51 = vshrl.u32 %v612_v43, 16  ;;  %v675_v52 = vshrl.u32 %v611_v44, 16  ;;  %v674_v53 = vshrl.u32 %v610_v45, 16 }
  0x99   : > { %v745_v54 = vxor.u32 %v681_v46, %v617_v38  ;;  %v744_v55 = vxor.u32 %v680_v47, %v616_v39  ;;  %v743_v56 = vxor.u32 %v679_v48, %v615_v40  ;;  %v742_v57 = vxor.u32 %v678_v49, %v614_v41 }
  0x9a   : > { %v741_v58 = vxor.u32 %v677_v50, %v613_v42  ;;  %v740_v59 = vxor.u32 %v676_v51, %v612_v43  ;;  %v739_v60 = vxor.u32 %v675_v52, %v611_v44  ;;  %v738_v61 = vxor.u32 %v674_v53, %v610_v45 }
  0x9b   : > { %v809_v62 = vmul.u32 2146121005, %v745_v54  ;;  %v808_v63 = vmul.u32 2146121005, %v744_v55  ;;  %v2859_v1 = vadd.s32 %v2809_v5, %v422_v29  ;;  %v2862_v6 = vadd.s32 48, %v2807_v3  ;;  %v380_v54 = vld [vmem:[%s2750_s16 + $0xf8] sm:$0xff] }
  0x9c   : > { %v807_v2 = vmul.u32 2146121005, %v743_v56  ;;  %v806_v4 = vmul.u32 2146121005, %v742_v57  ;;  %v2865_v7 = vadd.s32 40, %v2807_v3  ;;  %v379_v56 = vld [vmem:[%s2750_s16 + $0xf0] sm:$0xff] }
  0x9d   : > { %v873_v9 = vshrl.u32 %v809_v62, 15  ;;  %v872_v10 = vshrl.u32 %v808_v63, 15  ;;  %v805_v11 = vmul.u32 2146121005, %v741_v58  ;;  %v804_v12 = vmul.u32 2146121005, %v740_v59 }
  0x9e   : > { %v871_v13 = vshrl.u32 %v807_v2, 15  ;;  %v870_v14 = vshrl.u32 %v806_v4, 15  ;;  %v803_v16 = vmul.u32 2146121005, %v739_v60  ;;  %v802_v17 = vmul.u32 2146121005, %v738_v61 }
  0x9f   : > { %v937_v18 = vxor.u32 %v873_v9, %v809_v62  ;;  %v936_v19 = vxor.u32 %v872_v10, %v808_v63  ;;  %v869_v22 = vshrl.u32 %v805_v11, 15  ;;  %v868_v23 = vshrl.u32 %v804_v12, 15  ;;  %v378_v60 = vld [vmem:[%s2750_s16 + $0xe8] sm:$0xff]  ;;  %v377_v62 = vld [vmem:[%s2750_s16 + $0xe0] sm:$0xff] }
  0xa0   : > { %v935_v25 = vxor.u32 %v871_v13, %v807_v2  ;;  %v934_v27 = vxor.u32 %v870_v14, %v806_v4  ;;  %v867_v28 = vshrl.u32 %v803_v16, 15  ;;  %v866_v29 = vshrl.u32 %v802_v17, 15  ;;  %v376_v14 = vld [vmem:[%s2750_s16 + $0xd8] sm:$0xff] }
  0xa1   : > { %v1001_v30 = vmul.u32 2221713035, %v937_v18  ;;  %v1000_v31 = vmul.u32 2221713035, %v936_v19  ;;  %v933_v32 = vxor.u32 %v869_v22, %v805_v11  ;;  %v932_v33 = vxor.u32 %v868_v23, %v804_v12  ;;  %v375_v22 = vld [vmem:[%s2750_s16 + $0xd0] sm:$0xff] }
  0xa2   : > { %v999_v34 = vmul.u32 2221713035, %v935_v25  ;;  %v998_v35 = vmul.u32 2221713035, %v934_v27  ;;  %v931_v36 = vxor.u32 %v867_v28, %v803_v16  ;;  %v930_v37 = vxor.u32 %v866_v29, %v802_v17 }
  0xa3   : > { %v1065_v38 = vshrl.u32 %v1001_v30, 16  ;;  %v1064_v39 = vshrl.u32 %v1000_v31, 16  ;;  %v997_v40 = vmul.u32 2221713035, %v933_v32  ;;  %v996_v41 = vmul.u32 2221713035, %v932_v33 }
  0xa4   : > { %v1063_v42 = vshrl.u32 %v999_v34, 16  ;;  %v1062_v43 = vshrl.u32 %v998_v35, 16  ;;  %v995_v44 = vmul.u32 2221713035, %v931_v36  ;;  %v994_v45 = vmul.u32 2221713035, %v930_v37 }
  0xa5   : > { %v1129_v46 = vxor.u32 %v1065_v38, %v1001_v30  ;;  %v1128_v47 = vxor.u32 %v1064_v39, %v1000_v31  ;;  %v1061_v48 = vshrl.u32 %v997_v40, 16  ;;  %v1060_v49 = vshrl.u32 %v996_v41, 16 }
  0xa6   : > { %v1127_v50 = vxor.u32 %v1063_v42, %v999_v34  ;;  %v1126_v51 = vxor.u32 %v1062_v43, %v998_v35  ;;  %v1059_v52 = vshrl.u32 %v995_v44, 16  ;;  %v1058_v53 = vshrl.u32 %v994_v45, 16 }
  0xa7   : > { %v1193_v55 = vand.u32 16777215, %v1129_v46  ;;  %v1192_v57 = vand.u32 16777215, %v1128_v47  ;;  %v1125_v58 = vxor.u32 %v1061_v48, %v997_v40  ;;  %v1124_v59 = vxor.u32 %v1060_v49, %v996_v41 }
  0xa8   : > { %v1191_v61 = vand.u32 16777215, %v1127_v50  ;;  %v1190_v63 = vand.u32 16777215, %v1126_v51  ;;  %v1123_v2 = vxor.u32 %v1059_v52, %v995_v44  ;;  %v1122_v4 = vxor.u32 %v1058_v53, %v994_v45 }
  0xa9   : > { %vm1257_vm0 = vcmp.ge.s32.totalorder %v1193_v55, 8388608  ;;  %vm1256_vm1 = vcmp.ge.s32.totalorder %v1192_v57, 8388608  ;;  %v1189_v9 = vand.u32 16777215, %v1125_v58  ;;  %v1188_v10 = vand.u32 16777215, %v1124_v59 }
  0xaa   : > { %1957 = vmatprep.subr.msk.mxu0 %vm1257_vm0, %v380_v54  ;;  %2032 = vmatprep.subr.msk.mxu1 %vm1257_vm0, %v380_v54  ;;  %vm1255_vm2 = vcmp.ge.s32.totalorder %v1191_v61, 8388608  ;;  %vm2871_vm3 = vcmp.ge.s32.totalorder %v1190_v63, 8388608  ;;  %v1187_v12 = vand.u32 16777215, %v1123_v2  ;;  %v1186_v13 = vand.u32 16777215, %v1122_v4 }
  0xab   : > { %1958 = vmatpush1.msk.msra.mxu0 %vm1256_vm1, %v379_v56  ;;  %2064 = vmatpush1.msk.msra.mxu1 %vm1256_vm1, %v379_v56  ;;  %vm2876_vm4 = vcmp.ge.s32.totalorder %v1189_v9, 8388608  ;;  %vm2880_vm5 = vcmp.ge.s32.totalorder %v1188_v10, 8388608  ;;  %v498_v18 = vmul.u32 512, %v2827_v20  ;;  %v497_v19 = vmul.u32 512, %v2830_v21  ;;  %v374_v20 = vld [vmem:[%s2750_s16 + $0xc8] sm:$0xff] }
  0xac   : > { %1959 = vmatprep.subr.msk.mxu0 %vm1255_vm2, %v378_v60  ;;  %2033 = vmatprep.subr.msk.mxu1 %vm1255_vm2, %v378_v60  ;;  %vm2887_vm6 = vcmp.ge.s32.totalorder %v1187_v12, 8388608  ;;  %vm2891_vm7 = vcmp.ge.s32.totalorder %v1186_v13, 8388608  ;;  %v496_v27 = vmul.u32 512, %v2833_v24  ;;  %v495_v28 = vmul.u32 512, %v2856_v0  ;;  %v373_v24 = vld [vmem:[%s2750_s16 + $0xc0] sm:$0xff] }
  0xad   : > { %1960 = vmatpush1.msk.msra.mxu0 %vm2871_vm3, %v377_v62  ;;  %2065 = vmatpush1.msk.msra.mxu1 %vm2871_vm3, %v377_v62  ;;  %v542_v21 = vadd.s32 %v498_v18, %v2820_v15  ;;  %v541_v29 = vadd.s32 %v498_v18, %v2812_v8  ;;  %v540_v30 = vadd.s32 %v497_v19, %v2820_v15  ;;  %v494_v31 = vmul.u32 512, %v2859_v1 }
  0xae   : > { %1961 = vmatprep.subr.msk.mxu0 %vm2876_vm4, %v376_v14  ;;  %2034 = vmatprep.subr.msk.mxu1 %vm2876_vm4, %v376_v14  ;;  %v539_v0 = vadd.s32 %v497_v19, %v2812_v8  ;;  %v538_v32 = vadd.s32 %v496_v27, %v2820_v15  ;;  %v537_v33 = vadd.s32 %v496_v27, %v2812_v8  ;;  %v2915_v34 = vadd.s32 32, %v2807_v3 }
  0xaf   : > { %1962 = vmatpush1.msk.msra.mxu0 %vm2880_vm5, %v375_v22  ;;  %2066 = vmatpush1.msk.msra.mxu1 %vm2880_vm5, %v375_v22  ;;  %v609_v1 = vadd.s32 %v2836_v26, %v542_v21  ;;  %v608_v35 = vadd.s32 %v2836_v26, %v541_v29  ;;  %v607_v36 = vadd.s32 %v2836_v26, %v540_v30  ;;  %v2925_v37 = vadd.s32 24, %v2807_v3 }
  0xb0   : > { %1963 = vmatprep.subr.msk.mxu0 %vm2887_vm6, %v374_v20  ;;  %2035 = vmatprep.subr.msk.mxu1 %vm2887_vm6, %v374_v20  ;;  %v606_v38 = vadd.s32 %v2836_v26, %v539_v0  ;;  %v605_v39 = vadd.s32 %v2836_v26, %v538_v32  ;;  %v604_v40 = vadd.s32 %v2836_v26, %v537_v33  ;;  %v2935_v41 = vadd.s32 16, %v2807_v3 }
  0xb1   : > { %1964 = vmatpush1.msk.msra.mxu0 %vm2891_vm7, %v373_v24  ;;  %2067 = vmatpush1.msk.msra.mxu1 %vm2891_vm7, %v373_v24  ;;  %v673_v42 = vshrl.u32 %v609_v1, 16  ;;  %v672_v43 = vshrl.u32 %v608_v35, 16  ;;  %v671_v44 = vshrl.u32 %v607_v36, 16  ;;  %v536_v45 = vadd.s32 %v495_v28, %v2820_v15 }
  0xb2   : > { %v670_v46 = vshrl.u32 %v606_v38, 16  ;;  %v669_v47 = vshrl.u32 %v605_v39, 16  ;;  %v668_v48 = vshrl.u32 %v604_v40, 16  ;;  %v535_v49 = vadd.s32 %v495_v28, %v2812_v8 }
  0xb3   : > { %v737_v50 = vxor.u32 %v673_v42, %v609_v1  ;;  %v736_v51 = vxor.u32 %v672_v43, %v608_v35  ;;  %v735_v52 = vxor.u32 %v671_v44, %v607_v36  ;;  %v603_v53 = vadd.s32 %v2836_v26, %v536_v45 }
  0xb4   : > { %v734_v54 = vxor.u32 %v670_v46, %v606_v38  ;;  %v733_v55 = vxor.u32 %v669_v47, %v605_v39  ;;  %v732_v56 = vxor.u32 %v668_v48, %v604_v40  ;;  %v602_v57 = vadd.s32 %v2836_v26, %v535_v49  ;;  %v372_v48 = vld [vmem:[%s2750_s16 + $0xb8] sm:$0xff] }
  0xb5   : > { %v801_v58 = vmul.u32 2146121005, %v737_v50  ;;  %v800_v59 = vmul.u32 2146121005, %v736_v51  ;;  %v667_v60 = vshrl.u32 %v603_v53, 16  ;;  %v2946_v61 = vadd.s32 %v494_v31, %v2820_v15 }
  0xb6   : > { %v799_v62 = vmul.u32 2146121005, %v735_v52  ;;  %v798_v63 = vmul.u32 2146121005, %v734_v54  ;;  %v666_v2 = vshrl.u32 %v602_v57, 16  ;;  %v2949_v4 = vadd.s32 %v494_v31, %v2812_v8  ;;  %v371_v54 = vld [vmem:[%s2750_s16 + $0xb0] sm:$0xff] }
  0xb7   : > { %v865_v9 = vshrl.u32 %v801_v58, 15  ;;  %v864_v10 = vshrl.u32 %v800_v59, 15  ;;  %v797_v11 = vmul.u32 2146121005, %v733_v55  ;;  %v796_v12 = vmul.u32 2146121005, %v732_v56 }
  0xb8   : > { %v863_v13 = vshrl.u32 %v799_v62, 15  ;;  %v862_v14 = vshrl.u32 %v798_v63, 15  ;;  %v731_v16 = vxor.u32 %v667_v60, %v603_v53  ;;  %v730_v17 = vxor.u32 %v666_v2, %v602_v57  ;;  %v370_v56 = vld [vmem:[%s2750_s16 + $0xa8] sm:$0xff] }
  0xb9   : > { %v929_v18 = vxor.u32 %v865_v9, %v801_v58  ;;  %v928_v19 = vxor.u32 %v864_v10, %v800_v59  ;;  %v861_v22 = vshrl.u32 %v797_v11, 15  ;;  %v860_v23 = vshrl.u32 %v796_v12, 15  ;;  %v369_v10 = vld [vmem:[%s2750_s16 + $0xa0] sm:$0xff] }
  0xba   : > { %v927_v25 = vxor.u32 %v863_v13, %v799_v62  ;;  %v926_v27 = vxor.u32 %v862_v14, %v798_v63  ;;  %v795_v28 = vmul.u32 2146121005, %v731_v16  ;;  %v794_v20 = vmul.u32 2146121005, %v730_v17  ;;  %v368_v14 = vld [vmem:[%s2750_s16 + $0x98] sm:$0xff] }
  0xbb   : > { %v993_v21 = vmul.u32 2221713035, %v929_v18  ;;  %v992_v29 = vmul.u32 2221713035, %v928_v19  ;;  %v925_v30 = vxor.u32 %v861_v22, %v797_v11  ;;  %v924_v31 = vxor.u32 %v860_v23, %v796_v12  ;;  %v367_v22 = vld [vmem:[%s2750_s16 + $0x90] sm:$0xff] }
  0xbc   : > { %v991_v24 = vmul.u32 2221713035, %v927_v25  ;;  %v990_v0 = vmul.u32 2221713035, %v926_v27  ;;  %v859_v32 = vshrl.u32 %v795_v28, 15  ;;  %v858_v33 = vshrl.u32 %v794_v20, 15 }
  0xbd   : > { %v1057_v1 = vshrl.u32 %v993_v21, 16  ;;  %v1056_v35 = vshrl.u32 %v992_v29, 16  ;;  %v989_v36 = vmul.u32 2221713035, %v925_v30  ;;  %v988_v38 = vmul.u32 2221713035, %v924_v31 }
  0xbe   : > { %v1055_v39 = vshrl.u32 %v991_v24, 16  ;;  %v1054_v40 = vshrl.u32 %v990_v0, 16  ;;  %v923_v42 = vxor.u32 %v859_v32, %v795_v28  ;;  %v922_v43 = vxor.u32 %v858_v33, %v794_v20 }
  0xbf   : > { %v1121_v44 = vxor.u32 %v1057_v1, %v993_v21  ;;  %v1120_v45 = vxor.u32 %v1056_v35, %v992_v29  ;;  %v1053_v46 = vshrl.u32 %v989_v36, 16  ;;  %v1052_v47 = vshrl.u32 %v988_v38, 16 }
  0xc0   : > { %v1119_v49 = vxor.u32 %v1055_v39, %v991_v24  ;;  %v1118_v50 = vxor.u32 %v1054_v40, %v990_v0  ;;  %v987_v51 = vmul.u32 2221713035, %v923_v42  ;;  %v986_v52 = vmul.u32 2221713035, %v922_v43 }
  0xc1   : > { %v1185_v53 = vand.u32 16777215, %v1121_v44  ;;  %v1184_v55 = vand.u32 16777215, %v1120_v45  ;;  %v1117_v57 = vxor.u32 %v1053_v46, %v989_v36  ;;  %v1116_v58 = vxor.u32 %v1052_v47, %v988_v38 }
  0xc2   : > { %v1183_v59 = vand.u32 16777215, %v1119_v49  ;;  %v1182_v60 = vand.u32 16777215, %v1118_v50  ;;  %v1051_v62 = vshrl.u32 %v987_v51, 16  ;;  %v1050_v63 = vshrl.u32 %v986_v52, 16 }
  0xc3   : > { %vm1249_vm8 = vcmp.ge.s32.totalorder %v1185_v53, 8388608  ;;  %vm1248_vm9 = vcmp.ge.s32.totalorder %v1184_v55, 8388608  ;;  %v1181_v2 = vand.u32 16777215, %v1117_v57  ;;  %v1180_v9 = vand.u32 16777215, %v1116_v58 }
  0xc4   : > { %1965 = vmatprep.subr.msk.mxu0 %vm1249_vm8, %v372_v48  ;;  %2036 = vmatprep.subr.msk.mxu1 %vm1249_vm8, %v372_v48  ;;  %vm1247_vm10 = vcmp.ge.s32.totalorder %v1183_v59, 8388608  ;;  %vm2955_vm11 = vcmp.ge.s32.totalorder %v1182_v60, 8388608  ;;  %v1115_v12 = vxor.u32 %v1051_v62, %v987_v51  ;;  %v1114_v13 = vxor.u32 %v1050_v63, %v986_v52 }
  0xc5   : > { %1966 = vmatpush1.msk.msra.mxu0 %vm1248_vm9, %v371_v54  ;;  %2068 = vmatpush1.msk.msra.mxu1 %vm1248_vm9, %v371_v54  ;;  %vm2960_vm12 = vcmp.ge.s32.totalorder %v1181_v2, 8388608  ;;  %vm2964_vm13 = vcmp.ge.s32.totalorder %v1180_v9, 8388608  ;;  %v601_v18 = vadd.s32 %v2836_v26, %v2946_v61  ;;  %v600_v19 = vadd.s32 %v2836_v26, %v2949_v4  ;;  %v366_v61 = vld [vmem:[%s2750_s16 + $0x88] sm:$0xff] }
  0xc6   : > { %1967 = vmatprep.subr.msk.mxu0 %vm1247_vm10, %v370_v56  ;;  %2037 = vmatprep.subr.msk.mxu1 %vm1247_vm10, %v370_v56  ;;  %v1179_v23 = vand.u32 16777215, %v1115_v12  ;;  %v1178_v25 = vand.u32 16777215, %v1114_v13  ;;  %v454_v27 = vadd.s32 %v2809_v5, %v2862_v6  ;;  %v453_v28 = vadd.s32 %v2809_v5, %v2865_v7  ;;  %v365_v6 = vld [vmem:[%s2750_s16 + $0x80] sm:$0xff] }
  0xc7   : > { %1968 = vmatpush1.msk.msra.mxu0 %vm2955_vm11, %v369_v10  ;;  %2069 = vmatpush1.msk.msra.mxu1 %vm2955_vm11, %v369_v10  ;;  %v665_v4 = vshrl.u32 %v601_v18, 16  ;;  %v664_v20 = vshrl.u32 %v600_v19, 16  ;;  %v452_v21 = vadd.s32 %v2809_v5, %v2915_v34  ;;  %v2986_v29 = vadd.s32 %v2809_v5, %v2925_v37 }
  0xc8   : > { %1969 = vmatprep.subr.msk.mxu0 %vm2960_vm12, %v368_v14  ;;  %2038 = vmatprep.subr.msk.mxu1 %vm2960_vm12, %v368_v14  ;;  %vm1243_vm14 = vcmp.ge.s32.totalorder %v1179_v23, 8388608  ;;  %vm2993_vm15 = vcmp.ge.s32.totalorder %v1178_v25, 8388608  ;;  %v493_v30 = vmul.u32 512, %v454_v27  ;;  %v492_v31 = vmul.u32 512, %v453_v28 }
  0xc9   : > { %1970 = vmatpush1.msk.msra.mxu0 %vm2964_vm13, %v367_v22  ;;  %2070 = vmatpush1.msk.msra.mxu1 %vm2964_vm13, %v367_v22  ;;  %v729_v34 = vxor.u32 %v665_v4, %v601_v18  ;;  %v728_v37 = vxor.u32 %v664_v20, %v600_v19  ;;  %v491_v24 = vmul.u32 512, %v452_v21  ;;  %v490_v0 = vmul.u32 512, %v2986_v29 }
  0xca   : > { %1971 = vmatprep.subr.msk.mxu0 %vm1243_vm14, %v366_v61  ;;  %2039 = vmatprep.subr.msk.mxu1 %vm1243_vm14, %v366_v61  ;;  %v532_v32 = vadd.s32 %v493_v30, %v2820_v15  ;;  %v531_v33 = vadd.s32 %v493_v30, %v2812_v8  ;;  %v530_v1 = vadd.s32 %v492_v31, %v2820_v15  ;;  %v3006_v35 = vadd.s32 8, %v2807_v3 }
  0xcb   : > { %1972 = vmatpush1.msk.msra.mxu0 %vm2993_vm15, %v365_v6  ;;  %2071 = vmatpush1.msk.msra.mxu1 %vm2993_vm15, %v365_v6  ;;  %v793_v36 = vmul.u32 2146121005, %v729_v34  ;;  %v792_v38 = vmul.u32 2146121005, %v728_v37  ;;  %v529_v39 = vadd.s32 %v492_v31, %v2812_v8  ;;  %v528_v40 = vadd.s32 %v491_v24, %v2820_v15  ;;  %v364_v31 = vld [vmem:[%s2750_s16 + $0x78] sm:$0xff] }
  0xcc   : > { %v599_v42 = vadd.s32 %v2836_v26, %v532_v32  ;;  %v598_v43 = vadd.s32 %v2836_v26, %v531_v33  ;;  %v597_v44 = vadd.s32 %v2836_v26, %v530_v1  ;;  %v527_v45 = vadd.s32 %v491_v24, %v2812_v8  ;;  %v363_v33 = vld [vmem:[%s2750_s16 + $0x70] sm:$0xff] }
  0xcd   : > { %v857_v46 = vshrl.u32 %v793_v36, 15  ;;  %v856_v47 = vshrl.u32 %v792_v38, 15  ;;  %v596_v48 = vadd.s32 %v2836_v26, %v529_v39  ;;  %v595_v49 = vadd.s32 %v2836_v26, %v528_v40 }
  0xce   : > { %v663_v50 = vshrl.u32 %v599_v42, 16  ;;  %v662_v51 = vshrl.u32 %v598_v43, 16  ;;  %v661_v52 = vshrl.u32 %v597_v44, 16  ;;  %v594_v53 = vadd.s32 %v2836_v26, %v527_v45 }
  0xcf   : > { %v921_v54 = vxor.u32 %v857_v46, %v793_v36  ;;  %v920_v55 = vxor.u32 %v856_v47, %v792_v38  ;;  %v660_v56 = vshrl.u32 %v596_v48, 16  ;;  %v659_v57 = vshrl.u32 %v595_v49, 16 }
  0xd0   : > { %v727_v58 = vxor.u32 %v663_v50, %v599_v42  ;;  %v726_v59 = vxor.u32 %v662_v51, %v598_v43  ;;  %v725_v60 = vxor.u32 %v661_v52, %v597_v44  ;;  %v658_v62 = vshrl.u32 %v594_v53, 16 }
  0xd1   : > { %v985_v63 = vmul.u32 2221713035, %v921_v54  ;;  %v984_v2 = vmul.u32 2221713035, %v920_v55  ;;  %v724_v9 = vxor.u32 %v660_v56, %v596_v48  ;;  %v723_v10 = vxor.u32 %v659_v57, %v595_v49 }
  0xd2   : > { %v791_v11 = vmul.u32 2146121005, %v727_v58  ;;  %v790_v12 = vmul.u32 2146121005, %v726_v59  ;;  %v722_v13 = vxor.u32 %v658_v62, %v594_v53  ;;  %v526_v14 = vadd.s32 %v490_v0, %v2820_v15  ;;  %v362_v59 = vld [vmem:[%s2750_s16 + $0x68] sm:$0xff]  ;;  %v361_v62 = vld [vmem:[%s2750_s16 + $0x60] sm:$0xff] }
  0xd3   : > { %v1049_v16 = vshrl.u32 %v985_v63, 16  ;;  %v1048_v17 = vshrl.u32 %v984_v2, 16  ;;  %v789_v18 = vmul.u32 2146121005, %v725_v60  ;;  %v788_v19 = vmul.u32 2146121005, %v724_v9 }
  0xd4   : > { %v855_v22 = vshrl.u32 %v791_v11, 15  ;;  %v854_v23 = vshrl.u32 %v790_v12, 15  ;;  %v787_v25 = vmul.u32 2146121005, %v723_v10  ;;  %v786_v27 = vmul.u32 2146121005, %v722_v13 }
  0xd5   : > { %v1113_v28 = vxor.u32 %v1049_v16, %v985_v63  ;;  %v1112_v61 = vxor.u32 %v1048_v17, %v984_v2  ;;  %v853_v4 = vshrl.u32 %v789_v18, 15  ;;  %v852_v20 = vshrl.u32 %v788_v19, 15  ;;  %v360_v10 = vld [vmem:[%s2750_s16 + $0x58] sm:$0xff]  ;;  %v359_v16 = vld [vmem:[%s2750_s16 + $0x50] sm:$0xff] }
  0xd6   : > { %v919_v21 = vxor.u32 %v855_v22, %v791_v11  ;;  %v918_v6 = vxor.u32 %v854_v23, %v790_v12  ;;  %v851_v7 = vshrl.u32 %v787_v25, 15  ;;  %v850_v30 = vshrl.u32 %v786_v27, 15  ;;  %v358_v22 = vld [vmem:[%s2750_s16 + $0x48] sm:$0xff] }
  0xd7   : > { %v1177_v34 = vand.u32 16777215, %v1113_v28  ;;  %v1176_v37 = vand.u32 16777215, %v1112_v61  ;;  %v917_v24 = vxor.u32 %v853_v4, %v789_v18  ;;  %v916_v32 = vxor.u32 %v852_v20, %v788_v19  ;;  %v357_v61 = vld [vmem:[%s2750_s16 + $0x40] sm:$0xff] }
  0xd8   : > { %v983_v1 = vmul.u32 2221713035, %v919_v21  ;;  %v982_v36 = vmul.u32 2221713035, %v918_v6  ;;  %v915_v38 = vxor.u32 %v851_v7, %v787_v25  ;;  %v914_v39 = vxor.u32 %v850_v30, %v786_v27 }
  0xd9   : > { %vm1241_vm0 = vcmp.ge.s32.totalorder %v1177_v34, 8388608  ;;  %vm1240_vm1 = vcmp.ge.s32.totalorder %v1176_v37, 8388608  ;;  %v981_v40 = vmul.u32 2221713035, %v917_v24  ;;  %v980_v42 = vmul.u32 2221713035, %v916_v32 }
  0xda   : > { %1973 = vmatprep.subr.msk.mxu0 %vm1241_vm0, %v364_v31  ;;  %2040 = vmatprep.subr.msk.mxu1 %vm1241_vm0, %v364_v31  ;;  %v1047_v43 = vshrl.u32 %v983_v1, 16  ;;  %v1046_v44 = vshrl.u32 %v982_v36, 16  ;;  %v979_v45 = vmul.u32 2221713035, %v915_v38  ;;  %v978_v46 = vmul.u32 2221713035, %v914_v39 }
  0xdb   : > { %1974 = vmatpush1.msk.msra.mxu0 %vm1240_vm1, %v363_v33  ;;  %2072 = vmatpush1.msk.msra.mxu1 %vm1240_vm1, %v363_v33  ;;  %v1045_v47 = vshrl.u32 %v981_v40, 16  ;;  %v1044_v48 = vshrl.u32 %v980_v42, 16  ;;  %v593_v49 = vadd.s32 %v2836_v26, %v526_v14  ;;  %v525_v50 = vadd.s32 %v490_v0, %v2812_v8 }
  0xdc   : > { %v1111_v51 = vxor.u32 %v1047_v43, %v983_v1  ;;  %v1110_v52 = vxor.u32 %v1046_v44, %v982_v36  ;;  %v1043_v53 = vshrl.u32 %v979_v45, 16  ;;  %v1042_v54 = vshrl.u32 %v978_v46, 16 }
  0xdd   : > { %v1109_v55 = vxor.u32 %v1045_v47, %v981_v40  ;;  %v1108_v56 = vxor.u32 %v1044_v48, %v980_v42  ;;  %v657_v57 = vshrl.u32 %v593_v49, 16  ;;  %v592_v58 = vadd.s32 %v2836_v26, %v525_v50 }
  0xde   : > { %v1175_v60 = vand.u32 16777215, %v1111_v51  ;;  %v1174_v63 = vand.u32 16777215, %v1110_v52  ;;  %v1107_v2 = vxor.u32 %v1043_v53, %v979_v45  ;;  %v1106_v9 = vxor.u32 %v1042_v54, %v978_v46 }
  0xdf   : > { %v1173_v29 = vand.u32 16777215, %v1109_v55  ;;  %v1172_v11 = vand.u32 16777215, %v1108_v56  ;;  %v721_v0 = vxor.u32 %v657_v57, %v593_v49  ;;  %v656_v12 = vshrl.u32 %v592_v58, 16 }
  0xe0   : > { %vm1239_vm2 = vcmp.ge.s32.totalorder %v1175_v60, 8388608  ;;  %vm1238_vm3 = vcmp.ge.s32.totalorder %v1174_v63, 8388608  ;;  %v1171_v13 = vand.u32 16777215, %v1107_v2  ;;  %v1170_v14 = vand.u32 16777215, %v1106_v9 }
  0xe1   : > { %1975 = vmatprep.subr.msk.mxu0 %vm1239_vm2, %v362_v59  ;;  %2041 = vmatprep.subr.msk.mxu1 %vm1239_vm2, %v362_v59  ;;  %vm1237_vm4 = vcmp.ge.s32.totalorder %v1173_v29, 8388608  ;;  %vm3035_vm5 = vcmp.ge.s32.totalorder %v1172_v11, 8388608  ;;  %v785_v18 = vmul.u32 2146121005, %v721_v0  ;;  %v720_v19 = vxor.u32 %v656_v12, %v592_v58  ;;  %v356_v2 = vld [vmem:[%s2750_s16 + $0x38] sm:$0xff]  ;;  %v1387_v0 = vld [vmem:[%s2743_s2 + $0x8] sm:$0xff] }
  0xe2   : > { %1976 = vmatpush1.msk.msra.mxu0 %vm1238_vm3, %v361_v62  ;;  %2073 = vmatpush1.msk.msra.mxu1 %vm1238_vm3, %v361_v62  ;;  %vm3040_vm6 = vcmp.ge.s32.totalorder %v1171_v13, 8388608  ;;  %vm3044_vm7 = vcmp.ge.s32.totalorder %v1170_v14, 8388608  ;;  %v450_v27 = vadd.s32 %v2809_v5, %v2935_v41  ;;  %v449_v28 = vadd.s32 %v2809_v5, %v3006_v35  ;;  %v1403_v12 = vld [vmem:[%s2743_s2 + $0x88] sm:$0xff]  ;;  %v355_v13 = vld [vmem:[%s2750_s16 + $0x30] sm:$0xff] }
  0xe3   : > { %1977 = vmatprep.subr.msk.mxu0 %vm1237_vm4, %v360_v10  ;;  %2042 = vmatprep.subr.msk.mxu1 %vm1237_vm4, %v360_v10  ;;  %v849_v4 = vshrl.u32 %v785_v18, 15  ;;  %v784_v20 = vmul.u32 2146121005, %v720_v19  ;;  %v448_v21 = vadd.s32 %v2809_v5, %v2807_v3  ;;  %v446_v6 = vadd.s32 248, %v2807_v3 }
  0xe4   : > { %1978 = vmatpush1.msk.msra.mxu0 %vm3035_vm5, %v359_v16  ;;  %2074 = vmatpush1.msk.msra.mxu1 %vm3035_vm5, %v359_v16  ;;  %v489_v41 = vmul.u32 512, %v450_v27  ;;  %v488_v7 = vmul.u32 512, %v449_v28  ;;  %v445_v35 = vadd.s32 240, %v2807_v3  ;;  %v3062_v30 = vadd.s32 232, %v2807_v3 }
  0xe5   : > { %1979 = vmatprep.subr.msk.mxu0 %vm3040_vm6, %v358_v22  ;;  %2043 = vmatprep.subr.msk.mxu1 %vm3040_vm6, %v358_v22  ;;  %v913_v31 = vxor.u32 %v849_v4, %v785_v18  ;;  %v848_v34 = vshrl.u32 %v784_v20, 15  ;;  %v487_v37 = vmul.u32 512, %v448_v21  ;;  %v3069_v24 = vadd.s32 %v2809_v5, %v446_v6 }
  0xe6   : > { %1980 = vmatpush1.msk.msra.mxu0 %vm3044_vm7, %v357_v61  ;;  %2075 = vmatpush1.msk.msra.mxu1 %vm3044_vm7, %v357_v61  ;;  %v524_v32 = vadd.s32 %v489_v41, %v2820_v15  ;;  %v523_v33 = vadd.s32 %v489_v41, %v2812_v8  ;;  %v522_v1 = vadd.s32 %v488_v7, %v2820_v15  ;;  %v3079_v36 = vadd.s32 224, %v2807_v3 }
  0xe7   : > { %v977_v38 = vmul.u32 2221713035, %v913_v31  ;;  %v912_v39 = vxor.u32 %v848_v34, %v784_v20  ;;  %v521_v40 = vadd.s32 %v488_v7, %v2812_v8  ;;  %v520_v42 = vadd.s32 %v487_v37, %v2820_v15  ;;  %1482 = vmatprep.mubr.f32.mxu0 %v1387_v0  ;;  %1530 = vmatprep.mubr.f32.mxu1 %v1403_v12 }
  0xe8   : > { %v591_v43 = vadd.s32 %v2836_v26, %v524_v32  ;;  %v590_v44 = vadd.s32 %v2836_v26, %v523_v33  ;;  %v589_v45 = vadd.s32 %v2836_v26, %v522_v1  ;;  %v519_v46 = vadd.s32 %v487_v37, %v2812_v8 }
  0xe9   : > { %v1041_v47 = vshrl.u32 %v977_v38, 16  ;;  %v976_v48 = vmul.u32 2221713035, %v912_v39  ;;  %v588_v49 = vadd.s32 %v2836_v26, %v521_v40  ;;  %v587_v50 = vadd.s32 %v2836_v26, %v520_v42 }
  0xea   : > { %v655_v51 = vshrl.u32 %v591_v43, 16  ;;  %v654_v52 = vshrl.u32 %v590_v44, 16  ;;  %v653_v53 = vshrl.u32 %v589_v45, 16  ;;  %v586_v54 = vadd.s32 %v2836_v26, %v519_v46 }
  0xeb   : > { %v1105_v55 = vxor.u32 %v1041_v47, %v977_v38  ;;  %v1040_v56 = vshrl.u32 %v976_v48, 16  ;;  %v652_v57 = vshrl.u32 %v588_v49, 16  ;;  %v651_v58 = vshrl.u32 %v587_v50, 16 }
  0xec   : > { %v719_v59 = vxor.u32 %v655_v51, %v591_v43  ;;  %v718_v60 = vxor.u32 %v654_v52, %v590_v44  ;;  %v717_v62 = vxor.u32 %v653_v53, %v589_v45  ;;  %v650_v63 = vshrl.u32 %v586_v54, 16 }
  0xed   : > { %v1169_v9 = vand.u32 16777215, %v1105_v55  ;;  %v1104_v10 = vxor.u32 %v1040_v56, %v976_v48  ;;  %v716_v29 = vxor.u32 %v652_v57, %v588_v49  ;;  %v715_v11 = vxor.u32 %v651_v58, %v587_v50 }
  0xee   : > { %v783_v14 = vmul.u32 2146121005, %v719_v59  ;;  %v782_v16 = vmul.u32 2146121005, %v718_v60  ;;  %v714_v17 = vxor.u32 %v650_v63, %v586_v54  ;;  %v3095_v18 = vadd.s32 %v2809_v5, %v445_v35  ;;  %v354_v60 = vld [vmem:[%s2750_s16 + $0x28] sm:$0xff]  ;;  %v353_v63 = vld [vmem:[%s2750_s16 + $0x20] sm:$0xff] }
  0xef   : > { %vm1233_vm8 = vcmp.ge.s32.totalorder %v1169_v9, 8388608  ;;  %v1168_v19 = vand.u32 16777215, %v1104_v10  ;;  %v781_v22 = vmul.u32 2146121005, %v717_v62  ;;  %v518_v23 = vmul.u32 512, %v3069_v24 }
  0xf0   : > { %1981 = vmatprep.subr.msk.mxu0 %vm1233_vm8, %v356_v2  ;;  %2044 = vmatprep.subr.msk.mxu1 %vm1233_vm8, %v356_v2  ;;  %v847_v25 = vshrl.u32 %v783_v14, 15  ;;  %v846_v27 = vshrl.u32 %v782_v16, 15  ;;  %v780_v28 = vmul.u32 2146121005, %v716_v29  ;;  %v779_v61 = vmul.u32 2146121005, %v715_v11 }
  0xf1   : > { %vm1232_vm9 = vcmp.ge.s32.totalorder %v1168_v19, 8388608  ;;  %v845_v4 = vshrl.u32 %v781_v22, 15  ;;  %v778_v20 = vmul.u32 2146121005, %v714_v17  ;;  %v582_v21 = vadd.s32 %v518_v23, %v2820_v15  ;;  %v352_v29 = vld [vmem:[%s2750_s16 + $0x18] sm:$0xff]  ;;  %v351_v17 = vld [vmem:[%s2750_s16 + $0x10] sm:$0xff] }
  0xf2   : > { %1982 = vmatpush1.msk.msra.mxu0 %vm1232_vm9, %v355_v13  ;;  %2076 = vmatpush1.msk.msra.mxu1 %vm1232_vm9, %v355_v13  ;;  %v911_v6 = vxor.u32 %v847_v25, %v783_v14  ;;  %v910_v41 = vxor.u32 %v846_v27, %v782_v16  ;;  %v844_v7 = vshrl.u32 %v780_v28, 15  ;;  %v843_v35 = vshrl.u32 %v779_v61, 15  ;;  %v350_v25 = vld [vmem:[%s2750_s16 + $0x8] sm:$0xff] }
  0xf3   : > { %v909_v31 = vxor.u32 %v845_v4, %v781_v22  ;;  %v842_v34 = vshrl.u32 %v778_v20, 15  ;;  %v649_v37 = vadd.s32 %v2836_v26, %v582_v21  ;;  %v581_v24 = vadd.s32 %v518_v23, %v2812_v8  ;;  %v349_v4 = vld [vmem:[%s2750_s16] sm:$0xff] }
  0xf4   : > { %v975_v32 = vmul.u32 2221713035, %v911_v6  ;;  %v974_v33 = vmul.u32 2221713035, %v910_v41  ;;  %v908_v1 = vxor.u32 %v844_v7, %v780_v28  ;;  %v907_v38 = vxor.u32 %v843_v35, %v779_v61 }
  0xf5   : > { %v973_v39 = vmul.u32 2221713035, %v909_v31  ;;  %v906_v40 = vxor.u32 %v842_v34, %v778_v20  ;;  %v713_v42 = vshrl.u32 %v649_v37, 16  ;;  %v648_v43 = vadd.s32 %v2836_v26, %v581_v24 }
  0xf6   : > { %v1039_v44 = vshrl.u32 %v975_v32, 16  ;;  %v1038_v45 = vshrl.u32 %v974_v33, 16  ;;  %v972_v46 = vmul.u32 2221713035, %v908_v1  ;;  %v971_v47 = vmul.u32 2221713035, %v907_v38 }
  0xf7   : > { %v1037_v48 = vshrl.u32 %v973_v39, 16  ;;  %v970_v49 = vmul.u32 2221713035, %v906_v40  ;;  %v777_v50 = vxor.u32 %v713_v42, %v649_v37  ;;  %v712_v51 = vshrl.u32 %v648_v43, 16 }
  0xf8   : > { %v1103_v52 = vxor.u32 %v1039_v44, %v975_v32  ;;  %v1102_v53 = vxor.u32 %v1038_v45, %v974_v33  ;;  %v1036_v54 = vshrl.u32 %v972_v46, 16  ;;  %v1035_v55 = vshrl.u32 %v971_v47, 16 }
  0xf9   : > { %v1101_v56 = vxor.u32 %v1037_v48, %v973_v39  ;;  %v1034_v57 = vshrl.u32 %v970_v49, 16  ;;  %v841_v58 = vmul.u32 2146121005, %v777_v50  ;;  %v776_v59 = vxor.u32 %v712_v51, %v648_v43 }
  0xfa   : > { %v1167_v62 = vand.u32 16777215, %v1103_v52  ;;  %v1166_v2 = vand.u32 16777215, %v1102_v53  ;;  %v1100_v9 = vxor.u32 %v1036_v54, %v972_v46  ;;  %v1099_v10 = vxor.u32 %v1035_v55, %v971_v47  ;;  %v412_v47 = vld [vmem:[%s2750_s16 + $0x1f8] sm:$0xff] }
  0xfb   : > { %v1165_v11 = vand.u32 16777215, %v1101_v56  ;;  %v1098_v0 = vxor.u32 %v1034_v57, %v970_v49  ;;  %v905_v12 = vshrl.u32 %v841_v58, 15  ;;  %v840_v13 = vmul.u32 2146121005, %v776_v59  ;;  %v411_v56 = vld [vmem:[%s2750_s16 + $0x1f0] sm:$0xff] }
  0xfc   : > { %vm1231_vm10 = vcmp.ge.s32.totalorder %v1167_v62, 8388608  ;;  %vm1230_vm11 = vcmp.ge.s32.totalorder %v1166_v2, 8388608  ;;  %v1164_v14 = vand.u32 16777215, %v1100_v9  ;;  %v1163_v16 = vand.u32 16777215, %v1099_v10 }
  0xfd   : > { %1983 = vmatprep.subr.msk.mxu0 %vm1231_vm10, %v354_v60  ;;  %2045 = vmatprep.subr.msk.mxu1 %vm1231_vm10, %v354_v60  ;;  %vm1229_vm12 = vcmp.ge.s32.totalorder %v1165_v11, 8388608  ;;  %v1162_v19 = vand.u32 16777215, %v1098_v0  ;;  %v969_v22 = vxor.u32 %v905_v12, %v841_v58  ;;  %v904_v23 = vshrl.u32 %v840_v13, 15 }
  0xfe   : > { %1984 = vmatpush1.msk.msra.mxu0 %vm1230_vm11, %v353_v63  ;;  %2077 = vmatpush1.msk.msra.mxu1 %vm1230_vm11, %v353_v63  ;;  %vm1228_vm13 = vcmp.ge.s32.totalorder %v1164_v14, 8388608  ;;  %vm3107_vm14 = vcmp.ge.s32.totalorder %v1163_v16, 8388608  ;;  %v517_v28 = vmul.u32 512, %v3095_v18  ;;  %v477_v61 = vadd.s32 %v2809_v5, %v3062_v30 }
  0xff   : > { %1985 = vmatprep.subr.msk.mxu0 %vm1229_vm12, %v352_v29  ;;  %2046 = vmatprep.subr.msk.mxu1 %vm1229_vm12, %v352_v29  ;;  %vm3115_vm15 = vcmp.ge.s32.totalorder %v1162_v19, 8388608  ;;  %v1033_v21 = vmul.u32 2221713035, %v969_v22  ;;  %v968_v6 = vxor.u32 %v904_v23, %v840_v13  ;;  %v476_v41 = vadd.s32 %v2809_v5, %v3079_v36 }
 0x100   : > { %1986 = vmatpush1.msk.msra.mxu0 %vm1228_vm13, %v351_v17  ;;  %2078 = vmatpush1.msk.msra.mxu1 %vm1228_vm13, %v351_v17  ;;  %v580_v7 = vadd.s32 %v517_v28, %v2820_v15  ;;  %v579_v18 = vadd.s32 %v517_v28, %v2812_v8  ;;  %v516_v35 = vmul.u32 512, %v477_v61  ;;  %v442_v30 = vadd.s32 216, %v2807_v3 }
 0x101   : > { %1987 = vmatprep.subr.msk.mxu0 %vm3107_vm14, %v350_v25  ;;  %2047 = vmatprep.subr.msk.mxu1 %vm3107_vm14, %v350_v25  ;;  %v1097_v31 = vshrl.u32 %v1033_v21, 16  ;;  %v1032_v34 = vmul.u32 2221713035, %v968_v6  ;;  %v515_v37 = vmul.u32 512, %v476_v41  ;;  %v441_v36 = vadd.s32 208, %v2807_v3 }
 0x102   : > { %1988 = vmatpush1.msk.msra.mxu0 %vm3115_vm15, %v349_v4  ;;  %2079 = vmatpush1.msk.msra.mxu1 %vm3115_vm15, %v349_v4  ;;  %v647_v24 = vadd.s32 %v2836_v26, %v580_v7  ;;  %v646_v32 = vadd.s32 %v2836_v26, %v579_v18  ;;  %v578_v33 = vadd.s32 %v516_v35, %v2820_v15  ;;  %v440_v1 = vadd.s32 200, %v2807_v3 }
 0x103   : > { %v1161_v38 = vxor.u32 %v1097_v31, %v1033_v21  ;;  %v1096_v39 = vshrl.u32 %v1032_v34, 16  ;;  %v577_v40 = vadd.s32 %v516_v35, %v2812_v8  ;;  %v576_v42 = vadd.s32 %v515_v37, %v2820_v15 }
 0x104   : > { %v711_v43 = vshrl.u32 %v647_v24, 16  ;;  %v710_v44 = vshrl.u32 %v646_v32, 16  ;;  %v645_v45 = vadd.s32 %v2836_v26, %v578_v33  ;;  %v575_v46 = vadd.s32 %v515_v37, %v2812_v8 }
 0x105   : > { %v1225_v48 = vand.u32 16777215, %v1161_v38  ;;  %v1160_v49 = vxor.u32 %v1096_v39, %v1032_v34  ;;  %v644_v50 = vadd.s32 %v2836_v26, %v577_v40  ;;  %v643_v51 = vadd.s32 %v2836_v26, %v576_v42 }
 0x106   : > { %v775_v52 = vxor.u32 %v711_v43, %v647_v24  ;;  %v774_v53 = vxor.u32 %v710_v44, %v646_v32  ;;  %v709_v54 = vshrl.u32 %v645_v45, 16  ;;  %v642_v55 = vadd.s32 %v2836_v26, %v575_v46 }
 0x107   : > { %vm1289_vm0 = vcmp.ge.s32.totalorder %v1225_v48, 8388608  ;;  %v1224_v57 = vand.u32 16777215, %v1160_v49  ;;  %v708_v58 = vshrl.u32 %v644_v50, 16  ;;  %v707_v59 = vshrl.u32 %v643_v51, 16  ;;  %v410_v48 = vld [vmem:[%s2750_s16 + $0x1e8] sm:$0xff] }
 0x108   : > { %1989 = vmatprep.subr.msk.mxu0 %vm1289_vm0, %v412_v47  ;;  %2048 = vmatprep.subr.msk.mxu1 %vm1289_vm0, %v412_v47  ;;  %v839_v60 = vmul.u32 2146121005, %v775_v52  ;;  %v838_v62 = vmul.u32 2146121005, %v774_v53  ;;  %v773_v63 = vxor.u32 %v709_v54, %v645_v45  ;;  %v706_v2 = vshrl.u32 %v642_v55, 16  ;;  %v409_v53 = vld [vmem:[%s2750_s16 + $0x1e0] sm:$0xff] }
 0x109   : > { %vm1288_vm1 = vcmp.ge.s32.totalorder %v1224_v57, 8388608  ;;  %v772_v9 = vxor.u32 %v708_v58, %v644_v50  ;;  %v771_v10 = vxor.u32 %v707_v59, %v643_v51  ;;  %v475_v29 = vadd.s32 %v2809_v5, %v442_v30  ;;  %v408_v58 = vld [vmem:[%s2750_s16 + $0x1d8] sm:$0xff] }
 0x10a   : > { %1990 = vmatpush2.msk.msra.mxu0 %vm1288_vm1, %v411_v56  ;;  %2080 = vmatpush2.msk.msra.mxu1 %vm1288_vm1, %v411_v56  ;;  %v903_v11 = vshrl.u32 %v839_v60, 15  ;;  %v902_v0 = vshrl.u32 %v838_v62, 15  ;;  %v837_v12 = vmul.u32 2146121005, %v773_v63  ;;  %v770_v13 = vxor.u32 %v706_v2, %v642_v55 }
 0x10b   : > { %v836_v14 = vmul.u32 2146121005, %v772_v9  ;;  %v835_v16 = vmul.u32 2146121005, %v771_v10  ;;  %v3148_v17 = vadd.s32 %v2809_v5, %v441_v36  ;;  %v3151_v19 = vadd.s32 %v2809_v5, %v440_v1 }
 0x10c   : > { %v967_v22 = vxor.u32 %v903_v11, %v839_v60  ;;  %v966_v23 = vxor.u32 %v902_v0, %v838_v62  ;;  %v901_v25 = vshrl.u32 %v837_v12, 15  ;;  %v834_v27 = vmul.u32 2146121005, %v770_v13  ;;  %v407_v60 = vld [vmem:[%s2750_s16 + $0x1d0] sm:$0xff]  ;;  %v405_v13 = vld [vmem:[%s2750_s16 + $0x1c0] sm:$0xff] }
 0x10d   : > { %v900_v28 = vshrl.u32 %v836_v14, 15  ;;  %v899_v61 = vshrl.u32 %v835_v16, 15  ;;  %v514_v4 = vmul.u32 512, %v475_v29  ;;  %v513_v20 = vmul.u32 512, %v3148_v17  ;;  %v406_v29 = vld [vmem:[%s2750_s16 + $0x1c8] sm:$0xff] }
 0x10e   : > { %v1031_v21 = vmul.u32 2221713035, %v967_v22  ;;  %v1030_v6 = vmul.u32 2221713035, %v966_v23  ;;  %v965_v41 = vxor.u32 %v901_v25, %v837_v12  ;;  %v898_v7 = vshrl.u32 %v834_v27, 15 }
 0x10f   : > { %v964_v18 = vxor.u32 %v900_v28, %v836_v14  ;;  %v963_v35 = vxor.u32 %v899_v61, %v835_v16  ;;  %v574_v30 = vadd.s32 %v514_v4, %v2820_v15  ;;  %v573_v31 = vadd.s32 %v514_v4, %v2812_v8 }
 0x110   : > { %v1095_v34 = vshrl.u32 %v1031_v21, 16  ;;  %v1094_v37 = vshrl.u32 %v1030_v6, 16  ;;  %v1029_v36 = vmul.u32 2221713035, %v965_v41  ;;  %v962_v24 = vxor.u32 %v898_v7, %v834_v27 }
 0x111   : > { %v1028_v32 = vmul.u32 2221713035, %v964_v18  ;;  %v1027_v33 = vmul.u32 2221713035, %v963_v35  ;;  %v641_v1 = vadd.s32 %v2836_v26, %v574_v30  ;;  %v640_v38 = vadd.s32 %v2836_v26, %v573_v31 }
 0x112   : > { %v1159_v39 = vxor.u32 %v1095_v34, %v1031_v21  ;;  %v1158_v40 = vxor.u32 %v1094_v37, %v1030_v6  ;;  %v1093_v42 = vshrl.u32 %v1029_v36, 16  ;;  %v1026_v43 = vmul.u32 2221713035, %v962_v24 }
 0x113   : > { %v1092_v44 = vshrl.u32 %v1028_v32, 16  ;;  %v1091_v45 = vshrl.u32 %v1027_v33, 16  ;;  %v705_v46 = vshrl.u32 %v641_v1, 16  ;;  %v704_v47 = vshrl.u32 %v640_v38, 16 }
 0x114   : > { %v1223_v49 = vand.u32 16777215, %v1159_v39  ;;  %v1222_v50 = vand.u32 16777215, %v1158_v40  ;;  %v1157_v51 = vxor.u32 %v1093_v42, %v1029_v36  ;;  %v1090_v52 = vshrl.u32 %v1026_v43, 16 }
 0x115   : > { %v1156_v54 = vxor.u32 %v1092_v44, %v1028_v32  ;;  %v1155_v55 = vxor.u32 %v1091_v45, %v1027_v33  ;;  %v769_v56 = vxor.u32 %v705_v46, %v641_v1  ;;  %v768_v57 = vxor.u32 %v704_v47, %v640_v38 }
 0x116   : > { %vm1287_vm2 = vcmp.ge.s32.totalorder %v1223_v49, 8388608  ;;  %vm1286_vm3 = vcmp.ge.s32.totalorder %v1222_v50, 8388608  ;;  %v1221_v59 = vand.u32 16777215, %v1157_v51  ;;  %v1154_v62 = vxor.u32 %v1090_v52, %v1026_v43  ;;  %v404_v49 = vld [vmem:[%s2750_s16 + $0x1b8] sm:$0xff]  ;;  %v403_v51 = vld [vmem:[%s2750_s16 + $0x1b0] sm:$0xff] }
 0x117   : > { %1991 = vmatprep.subr.msk.mxu0 %vm1287_vm2, %v410_v48  ;;  %2049 = vmatprep.subr.msk.mxu1 %vm1287_vm2, %v410_v48  ;;  %v1220_v63 = vand.u32 16777215, %v1156_v54  ;;  %v1219_v2 = vand.u32 16777215, %v1155_v55  ;;  %v833_v9 = vmul.u32 2146121005, %v769_v56  ;;  %v572_v10 = vadd.s32 %v513_v20, %v2820_v15 }
 0x118   : > { %1992 = vmatpush2.msk.msra.mxu0 %vm1286_vm3, %v409_v53  ;;  %2081 = vmatpush2.msk.msra.mxu1 %vm1286_vm3, %v409_v53  ;;  %vm1285_vm4 = vcmp.ge.s32.totalorder %v1221_v59, 8388608  ;;  %v1218_v11 = vand.u32 16777215, %v1154_v62  ;;  %v832_v0 = vmul.u32 2146121005, %v768_v57  ;;  %v571_v12 = vadd.s32 %v513_v20, %v2812_v8 }
 0x119   : > { %1993 = vmatprep.subr.msk.mxu0 %vm1285_vm4, %v408_v58  ;;  %2050 = vmatprep.subr.msk.mxu1 %vm1285_vm4, %v408_v58  ;;  %vm1284_vm5 = vcmp.ge.s32.totalorder %v1220_v63, 8388608  ;;  %vm1283_vm6 = vcmp.ge.s32.totalorder %v1219_v2, 8388608  ;;  %v897_v14 = vshrl.u32 %v833_v9, 15  ;;  %v639_v16 = vadd.s32 %v2836_v26, %v572_v10 }
 0x11a   : > { %1994 = vmatpush2.msk.msra.mxu0 %vm1284_vm5, %v407_v60  ;;  %2082 = vmatpush2.msk.msra.mxu1 %vm1284_vm5, %v407_v60  ;;  %vm1282_vm7 = vcmp.ge.s32.totalorder %v1218_v11, 8388608  ;;  %v896_v17 = vshrl.u32 %v832_v0, 15  ;;  %v638_v22 = vadd.s32 %v2836_v26, %v571_v12  ;;  %v512_v23 = vmul.u32 512, %v3151_v19 }
 0x11b   : > { %1995 = vmatprep.subr.msk.mxu0 %vm1283_vm6, %v406_v29  ;;  %2051 = vmatprep.subr.msk.mxu1 %vm1283_vm6, %v406_v29  ;;  %v961_v25 = vxor.u32 %v897_v14, %v833_v9  ;;  %v703_v27 = vshrl.u32 %v639_v16, 16  ;;  %v439_v28 = vadd.s32 192, %v2807_v3  ;;  %v438_v61 = vadd.s32 184, %v2807_v3 }
 0x11c   : > { %1996 = vmatpush2.msk.msra.mxu0 %vm1282_vm7, %v405_v13  ;;  %2083 = vmatpush2.msk.msra.mxu1 %vm1282_vm7, %v405_v13  ;;  %v960_v4 = vxor.u32 %v896_v17, %v832_v0  ;;  %v702_v20 = vshrl.u32 %v638_v22, 16  ;;  %v570_v21 = vadd.s32 %v512_v23, %v2820_v15  ;;  %v569_v6 = vadd.s32 %v512_v23, %v2812_v8 }
 0x11d   : > { %v1025_v41 = vmul.u32 2221713035, %v961_v25  ;;  %v767_v7 = vxor.u32 %v703_v27, %v639_v16  ;;  %v472_v19 = vadd.s32 %v2809_v5, %v439_v28  ;;  %v471_v18 = vadd.s32 %v2809_v5, %v438_v61 }
 0x11e   : > { %v1024_v35 = vmul.u32 2221713035, %v960_v4  ;;  %v766_v30 = vxor.u32 %v702_v20, %v638_v22  ;;  %v637_v31 = vadd.s32 %v2836_v26, %v570_v21  ;;  %v636_v34 = vadd.s32 %v2836_v26, %v569_v6  ;;  %v402_v20 = vld [vmem:[%s2750_s16 + $0x1a8] sm:$0xff] }
 0x11f   : > { %v1089_v37 = vshrl.u32 %v1025_v41, 16  ;;  %v831_v36 = vmul.u32 2146121005, %v767_v7  ;;  %v511_v24 = vmul.u32 512, %v472_v19  ;;  %v437_v32 = vadd.s32 176, %v2807_v3  ;;  %v401_v19 = vld [vmem:[%s2750_s16 + $0x1a0] sm:$0xff] }
 0x120   : > { %v1088_v33 = vshrl.u32 %v1024_v35, 16  ;;  %v830_v1 = vmul.u32 2146121005, %v766_v30  ;;  %v701_v38 = vshrl.u32 %v637_v31, 16  ;;  %v700_v39 = vshrl.u32 %v636_v34, 16 }
 0x121   : > { %v1153_v40 = vxor.u32 %v1089_v37, %v1025_v41  ;;  %v895_v42 = vshrl.u32 %v831_v36, 15  ;;  %v568_v43 = vadd.s32 %v511_v24, %v2820_v15  ;;  %v567_v44 = vadd.s32 %v511_v24, %v2812_v8 }
 0x122   : > { %v1152_v45 = vxor.u32 %v1088_v33, %v1024_v35  ;;  %v894_v46 = vshrl.u32 %v830_v1, 15  ;;  %v765_v47 = vxor.u32 %v701_v38, %v637_v31  ;;  %v764_v48 = vxor.u32 %v700_v39, %v636_v34 }
 0x123   : > { %v1217_v50 = vand.u32 16777215, %v1153_v40  ;;  %v959_v52 = vxor.u32 %v895_v42, %v831_v36  ;;  %v635_v53 = vadd.s32 %v2836_v26, %v568_v43  ;;  %v634_v54 = vadd.s32 %v2836_v26, %v567_v44  ;;  %v400_v42 = vld [vmem:[%s2750_s16 + $0x198] sm:$0xff] }
 0x124   : > { %v1216_v55 = vand.u32 16777215, %v1152_v45  ;;  %v958_v56 = vxor.u32 %v894_v46, %v830_v1  ;;  %v829_v57 = vmul.u32 2146121005, %v765_v47  ;;  %v828_v58 = vmul.u32 2146121005, %v764_v48 }
 0x125   : > { %vm1281_vm8 = vcmp.ge.s32.totalorder %v1217_v50, 8388608  ;;  %v1023_v59 = vmul.u32 2221713035, %v959_v52  ;;  %v699_v60 = vshrl.u32 %v635_v53, 16  ;;  %v698_v62 = vshrl.u32 %v634_v54, 16  ;;  %v399_v47 = vld [vmem:[%s2750_s16 + $0x190] sm:$0xff] }
 0x126   : > { %1997 = vmatprep.subr.msk.mxu0 %vm1281_vm8, %v404_v49  ;;  %2052 = vmatprep.subr.msk.mxu1 %vm1281_vm8, %v404_v49  ;;  %vm1280_vm9 = vcmp.ge.s32.totalorder %v1216_v55, 8388608  ;;  %v1022_v63 = vmul.u32 2221713035, %v958_v56  ;;  %v893_v2 = vshrl.u32 %v829_v57, 15  ;;  %v892_v9 = vshrl.u32 %v828_v58, 15 }
 0x127   : > { %1998 = vmatpush2.msk.msra.mxu0 %vm1280_vm9, %v403_v51  ;;  %2084 = vmatpush2.msk.msra.mxu1 %vm1280_vm9, %v403_v51  ;;  %v1087_v10 = vshrl.u32 %v1023_v59, 16  ;;  %v763_v29 = vxor.u32 %v699_v60, %v635_v53  ;;  %v762_v11 = vxor.u32 %v698_v62, %v634_v54  ;;  %v510_v0 = vmul.u32 512, %v471_v18 }
 0x128   : > { %v1086_v12 = vshrl.u32 %v1022_v63, 16  ;;  %v957_v13 = vxor.u32 %v893_v2, %v829_v57  ;;  %v956_v14 = vxor.u32 %v892_v9, %v828_v58  ;;  %v470_v16 = vadd.s32 %v2809_v5, %v437_v32 }
 0x129   : > { %v1151_v17 = vxor.u32 %v1087_v10, %v1023_v59  ;;  %v827_v22 = vmul.u32 2146121005, %v763_v29  ;;  %v826_v23 = vmul.u32 2146121005, %v762_v11  ;;  %v566_v25 = vadd.s32 %v510_v0, %v2820_v15  ;;  %v397_v11 = vld [vmem:[%s2750_s16 + $0x180] sm:$0xff] }
 0x12a   : > { %v1150_v27 = vxor.u32 %v1086_v12, %v1022_v63  ;;  %v1021_v28 = vmul.u32 2221713035, %v957_v13  ;;  %v1020_v61 = vmul.u32 2221713035, %v956_v14  ;;  %v565_v4 = vadd.s32 %v510_v0, %v2812_v8  ;;  %v398_v63 = vld [vmem:[%s2750_s16 + $0x188] sm:$0xff] }
 0x12b   : > { %v1215_v21 = vand.u32 16777215, %v1151_v17  ;;  %v891_v6 = vshrl.u32 %v827_v22, 15  ;;  %v890_v41 = vshrl.u32 %v826_v23, 15  ;;  %v633_v7 = vadd.s32 %v2836_v26, %v566_v25 }
 0x12c   : > { %v1214_v18 = vand.u32 16777215, %v1150_v27  ;;  %v1085_v35 = vshrl.u32 %v1021_v28, 16  ;;  %v1084_v30 = vshrl.u32 %v1020_v61, 16  ;;  %v632_v31 = vadd.s32 %v2836_v26, %v565_v4 }
 0x12d   : > { %vm1279_vm10 = vcmp.ge.s32.totalorder %v1215_v21, 8388608  ;;  %v955_v34 = vxor.u32 %v891_v6, %v827_v22  ;;  %v954_v37 = vxor.u32 %v890_v41, %v826_v23  ;;  %v697_v36 = vshrl.u32 %v633_v7, 16 }
 0x12e   : > { %1999 = vmatprep.subr.msk.mxu0 %vm1279_vm10, %v402_v20  ;;  %2053 = vmatprep.subr.msk.mxu1 %vm1279_vm10, %v402_v20  ;;  %vm1278_vm11 = vcmp.ge.s32.totalorder %v1214_v18, 8388608  ;;  %v1149_v24 = vxor.u32 %v1085_v35, %v1021_v28  ;;  %v1148_v32 = vxor.u32 %v1084_v30, %v1020_v61  ;;  %v696_v33 = vshrl.u32 %v632_v31, 16 }
 0x12f   : > { %2000 = vmatpush2.msk.msra.mxu0 %vm1278_vm11, %v401_v19  ;;  %2085 = vmatpush2.msk.msra.mxu1 %vm1278_vm11, %v401_v19  ;;  %v1019_v1 = vmul.u32 2221713035, %v955_v34  ;;  %v1018_v38 = vmul.u32 2221713035, %v954_v37  ;;  %v761_v39 = vxor.u32 %v697_v36, %v633_v7  ;;  %v436_v40 = vadd.s32 168, %v2807_v3 }
 0x130   : > { %v1213_v43 = vand.u32 16777215, %v1149_v24  ;;  %v1212_v44 = vand.u32 16777215, %v1148_v32  ;;  %v760_v45 = vxor.u32 %v696_v33, %v632_v31  ;;  %v509_v46 = vmul.u32 512, %v470_v16  ;;  %v396_v24 = vld [vmem:[%s2750_s16 + $0x178] sm:$0xff] }
 0x131   : > { %v1083_v48 = vshrl.u32 %v1019_v1, 16  ;;  %v1082_v49 = vshrl.u32 %v1018_v38, 16  ;;  %v825_v50 = vmul.u32 2146121005, %v761_v39  ;;  %v469_v51 = vadd.s32 %v2809_v5, %v436_v40  ;;  %v395_v33 = vld [vmem:[%s2750_s16 + $0x170] sm:$0xff] }
 0x132   : > { %vm1277_vm12 = vcmp.ge.s32.totalorder %v1213_v43, 8388608  ;;  %vm1276_vm13 = vcmp.ge.s32.totalorder %v1212_v44, 8388608  ;;  %v824_v52 = vmul.u32 2146121005, %v760_v45  ;;  %v564_v53 = vadd.s32 %v509_v46, %v2820_v15 }
 0x133   : > { %2001 = vmatprep.subr.msk.mxu0 %vm1277_vm12, %v400_v42  ;;  %2054 = vmatprep.subr.msk.mxu1 %vm1277_vm12, %v400_v42  ;;  %v1147_v54 = vxor.u32 %v1083_v48, %v1019_v1  ;;  %v1146_v55 = vxor.u32 %v1082_v49, %v1018_v38  ;;  %v889_v56 = vshrl.u32 %v825_v50, 15  ;;  %v563_v57 = vadd.s32 %v509_v46, %v2812_v8 }
 0x134   : > { %2002 = vmatpush2.msk.msra.mxu0 %vm1276_vm13, %v399_v47  ;;  %2086 = vmatpush2.msk.msra.mxu1 %vm1276_vm13, %v399_v47  ;;  %v888_v58 = vshrl.u32 %v824_v52, 15  ;;  %v631_v59 = vadd.s32 %v2836_v26, %v564_v53  ;;  %v508_v60 = vmul.u32 512, %v469_v51  ;;  %v435_v62 = vadd.s32 160, %v2807_v3 }
 0x135   : > { %v1211_v2 = vand.u32 16777215, %v1147_v54  ;;  %v1210_v9 = vand.u32 16777215, %v1146_v55  ;;  %v953_v10 = vxor.u32 %v889_v56, %v825_v50  ;;  %v630_v29 = vadd.s32 %v2836_v26, %v563_v57 }
 0x136   : > { %v952_v0 = vxor.u32 %v888_v58, %v824_v52  ;;  %v695_v12 = vshrl.u32 %v631_v59, 16  ;;  %v562_v13 = vadd.s32 %v508_v60, %v2820_v15  ;;  %v561_v14 = vadd.s32 %v508_v60, %v2812_v8 }
 0x137   : > { %vm1275_vm14 = vcmp.ge.s32.totalorder %v1211_v2, 8388608  ;;  %vm1274_vm15 = vcmp.ge.s32.totalorder %v1210_v9, 8388608  ;;  %v1017_v16 = vmul.u32 2221713035, %v953_v10  ;;  %v694_v17 = vshrl.u32 %v630_v29, 16 }
 0x138   : > { %2003 = vmatprep.subr.msk.mxu0 %vm1275_vm14, %v398_v63  ;;  %2055 = vmatprep.subr.msk.mxu1 %vm1275_vm14, %v398_v63  ;;  %v1016_v22 = vmul.u32 2221713035, %v952_v0  ;;  %v759_v23 = vxor.u32 %v695_v12, %v631_v59  ;;  %v629_v25 = vadd.s32 %v2836_v26, %v562_v13  ;;  %v628_v27 = vadd.s32 %v2836_v26, %v561_v14  ;;  %v394_v14 = vld [vmem:[%s2750_s16 + $0x168] sm:$0xff] }
 0x139   : > { %2004 = vmatpush2.msk.msra.mxu0 %vm1274_vm15, %v397_v11  ;;  %2087 = vmatpush2.msk.msra.mxu1 %vm1274_vm15, %v397_v11  ;;  %v1081_v28 = vshrl.u32 %v1017_v16, 16  ;;  %v758_v61 = vxor.u32 %v694_v17, %v630_v29  ;;  %v468_v4 = vadd.s32 %v2809_v5, %v435_v62  ;;  %v434_v20 = vadd.s32 152, %v2807_v3 }
 0x13a   : > { %v1080_v21 = vshrl.u32 %v1016_v22, 16  ;;  %v823_v6 = vmul.u32 2146121005, %v759_v23  ;;  %v693_v41 = vshrl.u32 %v629_v25, 16  ;;  %v692_v7 = vshrl.u32 %v628_v27, 16 }
 0x13b   : > { %v1145_v19 = vxor.u32 %v1081_v28, %v1017_v16  ;;  %v822_v18 = vmul.u32 2146121005, %v758_v61  ;;  %v507_v35 = vmul.u32 512, %v468_v4  ;;  %v467_v30 = vadd.s32 %v2809_v5, %v434_v20 }
 0x13c   : > { %v1144_v31 = vxor.u32 %v1080_v21, %v1016_v22  ;;  %v887_v34 = vshrl.u32 %v823_v6, 15  ;;  %v757_v37 = vxor.u32 %v693_v41, %v629_v25  ;;  %v756_v36 = vxor.u32 %v692_v7, %v628_v27  ;;  %v393_v25 = vld [vmem:[%s2750_s16 + $0x160] sm:$0xff] }
 0x13d   : > { %v1209_v32 = vand.u32 16777215, %v1145_v19  ;;  %v886_v1 = vshrl.u32 %v822_v18, 15  ;;  %v560_v38 = vadd.s32 %v507_v35, %v2820_v15  ;;  %v559_v39 = vadd.s32 %v507_v35, %v2812_v8 }
 0x13e   : > { %v1208_v40 = vand.u32 16777215, %v1144_v31  ;;  %v951_v42 = vxor.u32 %v887_v34, %v823_v6  ;;  %v821_v43 = vmul.u32 2146121005, %v757_v37  ;;  %v820_v44 = vmul.u32 2146121005, %v756_v36 }
 0x13f   : > { %vm1273_vm0 = vcmp.ge.s32.totalorder %v1209_v32, 8388608  ;;  %v950_v45 = vxor.u32 %v886_v1, %v822_v18  ;;  %v627_v46 = vadd.s32 %v2836_v26, %v560_v38  ;;  %v626_v47 = vadd.s32 %v2836_v26, %v559_v39  ;;  %v392_v18 = vld [vmem:[%s2750_s16 + $0x158] sm:$0xff] }
 0x140   : > { %2005 = vmatprep.subr.msk.mxu0 %vm1273_vm0, %v396_v24  ;;  %2056 = vmatprep.subr.msk.mxu1 %vm1273_vm0, %v396_v24  ;;  %vm1272_vm1 = vcmp.ge.s32.totalorder %v1208_v40, 8388608  ;;  %v1015_v48 = vmul.u32 2221713035, %v951_v42  ;;  %v885_v49 = vshrl.u32 %v821_v43, 15  ;;  %v884_v50 = vshrl.u32 %v820_v44, 15 }
 0x141   : > { %2006 = vmatpush2.msk.msra.mxu0 %vm1272_vm1, %v395_v33  ;;  %2088 = vmatpush2.msk.msra.mxu1 %vm1272_vm1, %v395_v33  ;;  %v1014_v51 = vmul.u32 2221713035, %v950_v45  ;;  %v691_v52 = vshrl.u32 %v627_v46, 16  ;;  %v690_v53 = vshrl.u32 %v626_v47, 16  ;;  %v506_v54 = vmul.u32 512, %v467_v30  ;;  %v391_v30 = vld [vmem:[%s2750_s16 + $0x150] sm:$0xff] }
 0x142   : > { %v1079_v55 = vshrl.u32 %v1015_v48, 16  ;;  %v949_v56 = vxor.u32 %v885_v49, %v821_v43  ;;  %v948_v57 = vxor.u32 %v884_v50, %v820_v44  ;;  %v433_v58 = vadd.s32 144, %v2807_v3 }
 0x143   : > { %v1078_v59 = vshrl.u32 %v1014_v51, 16  ;;  %v755_v60 = vxor.u32 %v691_v52, %v627_v46  ;;  %v754_v62 = vxor.u32 %v690_v53, %v626_v47  ;;  %v558_v63 = vadd.s32 %v506_v54, %v2820_v15 }
 0x144   : > { %v1143_v2 = vxor.u32 %v1079_v55, %v1015_v48  ;;  %v1013_v9 = vmul.u32 2221713035, %v949_v56  ;;  %v1012_v10 = vmul.u32 2221713035, %v948_v57  ;;  %v557_v29 = vadd.s32 %v506_v54, %v2812_v8  ;;  %v390_v55 = vld [vmem:[%s2750_s16 + $0x148] sm:$0xff] }
 0x145   : > { %v1142_v11 = vxor.u32 %v1078_v59, %v1014_v51  ;;  %v819_v0 = vmul.u32 2146121005, %v755_v60  ;;  %v818_v12 = vmul.u32 2146121005, %v754_v62  ;;  %v625_v13 = vadd.s32 %v2836_v26, %v558_v63  ;;  %v389_v60 = vld [vmem:[%s2750_s16 + $0x140] sm:$0xff] }
 0x146   : > { %v1207_v16 = vand.u32 16777215, %v1143_v2  ;;  %v1077_v17 = vshrl.u32 %v1013_v9, 16  ;;  %v1076_v22 = vshrl.u32 %v1012_v10, 16  ;;  %v624_v23 = vadd.s32 %v2836_v26, %v557_v29 }
 0x147   : > { %v1206_v27 = vand.u32 16777215, %v1142_v11  ;;  %v883_v28 = vshrl.u32 %v819_v0, 15  ;;  %v882_v61 = vshrl.u32 %v818_v12, 15  ;;  %v689_v4 = vshrl.u32 %v625_v13, 16 }
 0x148   : > { %vm1271_vm2 = vcmp.ge.s32.totalorder %v1207_v16, 8388608  ;;  %v1141_v20 = vxor.u32 %v1077_v17, %v1013_v9  ;;  %v1140_v21 = vxor.u32 %v1076_v22, %v1012_v10  ;;  %v688_v6 = vshrl.u32 %v624_v23, 16 }
 0x149   : > { %2007 = vmatprep.subr.msk.mxu0 %vm1271_vm2, %v394_v14  ;;  %2057 = vmatprep.subr.msk.mxu1 %vm1271_vm2, %v394_v14  ;;  %vm1270_vm3 = vcmp.ge.s32.totalorder %v1206_v27, 8388608  ;;  %v947_v41 = vxor.u32 %v883_v28, %v819_v0  ;;  %v946_v7 = vxor.u32 %v882_v61, %v818_v12  ;;  %v753_v19 = vxor.u32 %v689_v4, %v625_v13 }
 0x14a   : > { %2008 = vmatpush2.msk.msra.mxu0 %vm1270_vm3, %v393_v25  ;;  %2089 = vmatpush2.msk.msra.mxu1 %vm1270_vm3, %v393_v25  ;;  %v1205_v35 = vand.u32 16777215, %v1141_v20  ;;  %v1204_v31 = vand.u32 16777215, %v1140_v21  ;;  %v752_v34 = vxor.u32 %v688_v6, %v624_v23  ;;  %v466_v37 = vadd.s32 %v2809_v5, %v433_v58  ;;  %v388_v20 = vld [vmem:[%s2750_s16 + $0x138] sm:$0xff] }
 0x14b   : > { %v1011_v36 = vmul.u32 2221713035, %v947_v41  ;;  %v1010_v24 = vmul.u32 2221713035, %v946_v7  ;;  %v432_v32 = vadd.s32 136, %v2807_v3  ;;  %v431_v33 = vadd.s32 128, %v2807_v3 }
 0x14c   : > { %vm1269_vm4 = vcmp.ge.s32.totalorder %v1205_v35, 8388608  ;;  %vm1268_vm5 = vcmp.ge.s32.totalorder %v1204_v31, 8388608  ;;  %v817_v1 = vmul.u32 2146121005, %v753_v19  ;;  %v816_v38 = vmul.u32 2146121005, %v752_v34 }
 0x14d   : > { %2009 = vmatprep.subr.msk.mxu0 %vm1269_vm4, %v392_v18  ;;  %2058 = vmatprep.subr.msk.mxu1 %vm1269_vm4, %v392_v18  ;;  %v1075_v39 = vshrl.u32 %v1011_v36, 16  ;;  %v1074_v40 = vshrl.u32 %v1010_v24, 16  ;;  %v505_v42 = vmul.u32 512, %v466_v37  ;;  %v465_v43 = vadd.s32 %v2809_v5, %v432_v32  ;;  %v387_v19 = vld [vmem:[%s2750_s16 + $0x130] sm:$0xff] }
 0x14e   : > { %2010 = vmatpush2.msk.msra.mxu0 %vm1268_vm5, %v391_v30  ;;  %2090 = vmatpush2.msk.msra.mxu1 %vm1268_vm5, %v391_v30  ;;  %v881_v44 = vshrl.u32 %v817_v1, 15  ;;  %v880_v45 = vshrl.u32 %v816_v38, 15  ;;  %v464_v46 = vadd.s32 %v2809_v5, %v431_v33 }
 0x14f   : > { %v1139_v47 = vxor.u32 %v1075_v39, %v1011_v36  ;;  %v1138_v48 = vxor.u32 %v1074_v40, %v1010_v24  ;;  %v556_v49 = vadd.s32 %v505_v42, %v2820_v15  ;;  %v555_v50 = vadd.s32 %v505_v42, %v2812_v8 }
 0x150   : > { %v945_v51 = vxor.u32 %v881_v44, %v817_v1  ;;  %v944_v52 = vxor.u32 %v880_v45, %v816_v38  ;;  %v504_v53 = vmul.u32 512, %v465_v43  ;;  %v503_v54 = vmul.u32 512, %v464_v46 }
 0x151   : > { %v1203_v56 = vand.u32 16777215, %v1139_v47  ;;  %v1202_v57 = vand.u32 16777215, %v1138_v48  ;;  %v623_v58 = vadd.s32 %v2836_v26, %v556_v49  ;;  %v622_v59 = vadd.s32 %v2836_v26, %v555_v50 }
 0x152   : > { %v1009_v62 = vmul.u32 2221713035, %v945_v51  ;;  %v1008_v5 = vmul.u32 2221713035, %v944_v52  ;;  %v554_v63 = vadd.s32 %v504_v53, %v2820_v15  ;;  %v553_v2 = vadd.s32 %v504_v53, %v2812_v8 }
 0x153   : > { %vm1267_vm6 = vcmp.ge.s32.totalorder %v1203_v56, 8388608  ;;  %vm1266_vm7 = vcmp.ge.s32.totalorder %v1202_v57, 8388608  ;;  %v687_v9 = vshrl.u32 %v623_v58, 16  ;;  %v686_v10 = vshrl.u32 %v622_v59, 16 }
 0x154   : > { %2011 = vmatprep.subr.msk.mxu0 %vm1267_vm6, %v390_v55  ;;  %2059 = vmatprep.subr.msk.mxu1 %vm1267_vm6, %v390_v55  ;;  %v1073_v29 = vshrl.u32 %v1009_v62, 16  ;;  %v1072_v11 = vshrl.u32 %v1008_v5, 16  ;;  %v621_v0 = vadd.s32 %v2836_v26, %v554_v63  ;;  %v620_v12 = vadd.s32 %v2836_v26, %v553_v2  ;;  %v386_v55 = vld [vmem:[%s2750_s16 + $0x128] sm:$0xff]  ;;  %v384_v2 = vld [vmem:[%s2750_s16 + $0x118] sm:$0xff] }
 0x155   : > { %2012 = vmatpush2.msk.msra.mxu0 %vm1266_vm7, %v389_v60  ;;  %2091 = vmatpush2.msk.msra.mxu1 %vm1266_vm7, %v389_v60  ;;  %v751_v13 = vxor.u32 %v687_v9, %v623_v58  ;;  %v750_v14 = vxor.u32 %v686_v10, %v622_v59  ;;  %v552_v16 = vadd.s32 %v503_v54, %v2820_v15  ;;  %v385_v59 = vld [vmem:[%s2750_s16 + $0x120] sm:$0xff] }
 0x156   : > { %v1137_v17 = vxor.u32 %v1073_v29, %v1009_v62  ;;  %v1136_v22 = vxor.u32 %v1072_v11, %v1008_v5  ;;  %v685_v23 = vshrl.u32 %v621_v0, 16  ;;  %v684_v25 = vshrl.u32 %v620_v12, 16  ;;  %v383_v11 = vld [vmem:[%s2750_s16 + $0x110] sm:$0xff] }
 0x157   : > { %v815_v27 = vmul.u32 2146121005, %v751_v13  ;;  %v814_v28 = vmul.u32 2146121005, %v750_v14  ;;  %v619_v61 = vadd.s32 %v2836_v26, %v552_v16  ;;  %v551_v4 = vadd.s32 %v503_v54, %v2812_v8  ;;  %v382_v14 = vld [vmem:[%s2750_s16 + $0x108] sm:$0xff] }
 0x158   : > { %v1201_v21 = vand.u32 16777215, %v1137_v17  ;;  %v1200_v6 = vand.u32 16777215, %v1136_v22  ;;  %v749_v41 = vxor.u32 %v685_v23, %v621_v0  ;;  %v748_v7 = vxor.u32 %v684_v25, %v620_v12  ;;  %v381_v17 = vld [vmem:[%s2750_s16 + $0x100] sm:$0xff] }
 0x159   : > { %v879_v18 = vshrl.u32 %v815_v27, 15  ;;  %v878_v35 = vshrl.u32 %v814_v28, 15  ;;  %v683_v30 = vshrl.u32 %v619_v61, 16  ;;  %v618_v15 = vadd.s32 %v2836_v26, %v551_v4  ;;  %v1386_v23 = vld [vmem:[%s2743_s2] sm:$0xff]  ;;  %v1404_v4 = vld [vmem:[%s2743_s2 + $0x90] sm:$0xff] }
 0x15a   : > { %vm1265_vm8 = vcmp.ge.s32.totalorder %v1201_v21, 8388608  ;;  %vm1264_vm9 = vcmp.ge.s32.totalorder %v1200_v6, 8388608  ;;  %v813_v31 = vmul.u32 2146121005, %v749_v41  ;;  %v812_v34 = vmul.u32 2146121005, %v748_v7 }
 0x15b   : > { %2013 = vmatprep.subr.msk.mxu0 %vm1265_vm8, %v388_v20  ;;  %2060 = vmatprep.subr.msk.mxu1 %vm1265_vm8, %v388_v20  ;;  %v943_v37 = vxor.u32 %v879_v18, %v815_v27  ;;  %v942_v36 = vxor.u32 %v878_v35, %v814_v28  ;;  %v747_v8 = vxor.u32 %v683_v30, %v619_v61  ;;  %v682_v24 = vshrl.u32 %v618_v15, 16  ;;  %v1402_v25 = vld [vmem:[%s2743_s2 + $0x80] sm:$0xff]  ;;  %v1389_v27 = vld [vmem:[%s2743_s2 + $0x18] sm:$0xff]  ;;  %v1388_v61 = vld [vmem:[%s2743_s2 + $0x10] sm:$0xff] }
 0x15c   : > { %2014 = vmatpush2.msk.msra.mxu0 %vm1264_vm9, %v387_v19  ;;  %2092 = vmatpush2.msk.msra.mxu1 %vm1264_vm9, %v387_v19  ;;  %v877_v32 = vshrl.u32 %v813_v31, 15  ;;  %v876_v33 = vshrl.u32 %v812_v34, 15  ;;  %v1405_v28 = vld [vmem:[%s2743_s2 + $0x98] sm:$0xff]  ;;  %v1391_v20 = vld [vmem:[%s2743_s2 + $0x28] sm:$0xff]  ;;  %v1390_v6 = vld [vmem:[%s2743_s2 + $0x20] sm:$0xff] }
 0x15d   : > { %v1007_v1 = vmul.u32 2221713035, %v943_v37  ;;  %v1006_v38 = vmul.u32 2221713035, %v942_v36  ;;  %v746_v39 = vxor.u32 %v682_v24, %v618_v15  ;;  %v1407_v21 = vld [vmem:[%s2743_s2 + $0xa8] sm:$0xff]  ;;  %v1406_v41 = vld [vmem:[%s2743_s2 + $0xa0] sm:$0xff] }
 0x15e   : > { %v941_v40 = vxor.u32 %v877_v32, %v813_v31  ;;  %v940_v26 = vxor.u32 %v876_v33, %v812_v34  ;;  %v811_v42 = vmul.u32 2146121005, %v747_v8  ;;  %v1393_v7 = vld [vmem:[%s2743_s2 + $0x38] sm:$0xff]  ;;  %v1392_v18 = vld [vmem:[%s2743_s2 + $0x30] sm:$0xff]  ;;  %v1395_v30 = vld [vmem:[%s2743_s2 + $0x48] sm:$0xff] }
 0x15f   : > { %v1071_v43 = vshrl.u32 %v1007_v1, 16  ;;  %v1070_v44 = vshrl.u32 %v1006_v38, 16  ;;  %v810_v45 = vmul.u32 2146121005, %v746_v39  ;;  %v1409_v19 = vld [vmem:[%s2743_s2 + $0xb8] sm:$0xff]  ;;  %v1408_v35 = vld [vmem:[%s2743_s2 + $0xb0] sm:$0xff] }
 0x160   : > { %v1005_v46 = vmul.u32 2221713035, %v941_v40  ;;  %v1004_v47 = vmul.u32 2221713035, %v940_v26  ;;  %v875_v48 = vshrl.u32 %v811_v42, 15  ;;  %v1411_v15 = vld [vmem:[%s2743_s2 + $0xc8] sm:$0xff] }
 0x161   : > { %v1135_v49 = vxor.u32 %v1071_v43, %v1007_v1  ;;  %v1134_v50 = vxor.u32 %v1070_v44, %v1006_v38  ;;  %v874_v51 = vshrl.u32 %v810_v45, 15  ;;  %v1394_v31 = vld [vmem:[%s2743_s2 + $0x40] sm:$0xff]  ;;  %v1397_v37 = vld [vmem:[%s2743_s2 + $0x58] sm:$0xff]  ;;  %v1396_v8 = vld [vmem:[%s2743_s2 + $0x50] sm:$0xff] }
 0x162   : > { %v1069_v52 = vshrl.u32 %v1005_v46, 16  ;;  %v1068_v53 = vshrl.u32 %v1004_v47, 16  ;;  %v939_v54 = vxor.u32 %v875_v48, %v811_v42  ;;  %v1410_v34 = vld [vmem:[%s2743_s2 + $0xc0] sm:$0xff]  ;;  %v1413_v36 = vld [vmem:[%s2743_s2 + $0xd8] sm:$0xff]  ;;  %v1412_v24 = vld [vmem:[%s2743_s2 + $0xd0] sm:$0xff] }
 0x163   : > { %v1199_v56 = vand.u32 16777215, %v1135_v49  ;;  %v1198_v57 = vand.u32 16777215, %v1134_v50  ;;  %v938_v58 = vxor.u32 %v874_v51, %v810_v45  ;;  %v1399_v32 = vld [vmem:[%s2743_s2 + $0x68] sm:$0xff]  ;;  %v1398_v1 = vld [vmem:[%s2743_s2 + $0x60] sm:$0xff] }
 0x164   : > { %v1133_v60 = vxor.u32 %v1069_v52, %v1005_v46  ;;  %v1132_v62 = vxor.u32 %v1068_v53, %v1004_v47  ;;  %v1003_v5 = vmul.u32 2221713035, %v939_v54  ;;  %v1415_v33 = vld [vmem:[%s2743_s2 + $0xe8] sm:$0xff]  ;;  %v1414_v38 = vld [vmem:[%s2743_s2 + $0xe0] sm:$0xff]  ;;  %v1401_v39 = vld [vmem:[%s2743_s2 + $0x78] sm:$0xff] }
 0x165   : > { %vm1263_vm10 = vcmp.ge.s32.totalorder %v1199_v56, 8388608  ;;  %vm1262_vm11 = vcmp.ge.s32.totalorder %v1198_v57, 8388608  ;;  %v1002_v63 = vmul.u32 2221713035, %v938_v58  ;;  %v1417_v40 = vld [vmem:[%s2743_s2 + $0xf8] sm:$0xff]  ;;  %v1400_v26 = vld [vmem:[%s2743_s2 + $0x70] sm:$0xff] }
 0x166   : > { %2015 = vmatprep.subr.msk.mxu0 %vm1263_vm10, %v386_v55  ;;  %2061 = vmatprep.subr.msk.mxu1 %vm1263_vm10, %v386_v55  ;;  %v1197_v9 = vand.u32 16777215, %v1133_v60  ;;  %v1196_v10 = vand.u32 16777215, %v1132_v62  ;;  %v1067_v29 = vshrl.u32 %v1003_v5, 16  ;;  %v1416_v42 = vld [vmem:[%s2743_s2 + $0xf0] sm:$0xff] }
 0x167   : > { %2016 = vmatpush2.msk.msra.mxu0 %vm1262_vm11, %v385_v59  ;;  %2093 = vmatpush2.msk.msra.mxu1 %vm1262_vm11, %v385_v59  ;;  %v1066_v0 = vshrl.u32 %v1002_v63, 16  ;;  %v1354_v43 = vld [vmem:[%s2770_s23] sm:$0xff]  ;;  %v1355_v47 = vld [vmem:[%s2770_s23 + $0x8] sm:$0xff]  ;;  %v1356_v53 = vld [vmem:[%s2770_s23 + $0x10] sm:$0xff] }
 0x168   : > { %vm1261_vm12 = vcmp.ge.s32.totalorder %v1197_v9, 8388608  ;;  %vm1260_vm13 = vcmp.ge.s32.totalorder %v1196_v10, 8388608  ;;  %v1131_v12 = vxor.u32 %v1067_v29, %v1003_v5  ;;  %v1370_v44 = vld [vmem:[%s2770_s23 + $0x80] sm:$0xff]  ;;  %v1371_v48 = vld [vmem:[%s2770_s23 + $0x88] sm:$0xff]  ;;  %v1372_v54 = vld [vmem:[%s2770_s23 + $0x90] sm:$0xff] }
 0x169   : > { %2017 = vmatprep.subr.msk.mxu0 %vm1261_vm12, %v384_v2  ;;  %2062 = vmatprep.subr.msk.mxu1 %vm1261_vm12, %v384_v2  ;;  %v1130_v13 = vxor.u32 %v1066_v0, %v1002_v63  ;;  %v1357_v59 = vld [vmem:[%s2770_s23 + $0x18] sm:$0xff]  ;;  %v1358_v9 = vld [vmem:[%s2770_s23 + $0x20] sm:$0xff] }
 0x16a   : > { %2018 = vmatpush2.msk.msra.mxu0 %vm1260_vm13, %v383_v11  ;;  %2094 = vmatpush2.msk.msra.mxu1 %vm1260_vm13, %v383_v11  ;;  %v1195_v16 = vand.u32 16777215, %v1131_v12  ;;  %v1373_v60 = vld [vmem:[%s2770_s23 + $0x98] sm:$0xff]  ;;  %v1374_v10 = vld [vmem:[%s2770_s23 + $0xa0] sm:$0xff] }
 0x16b   : > { %v1194_v22 = vand.u32 16777215, %v1130_v13  ;;  %v1359_v13 = vld [vmem:[%s2770_s23 + $0x28] sm:$0xff] }
 0x16c   : > { %vm1259_vm14 = vcmp.ge.s32.totalorder %v1195_v16, 8388608 }
 0x16d   : > { %2019 = vmatprep.subr.msk.mxu0 %vm1259_vm14, %v382_v14  ;;  %2063 = vmatprep.subr.msk.mxu1 %vm1259_vm14, %v382_v14  ;;  %vm1258_vm15 = vcmp.ge.s32.totalorder %v1194_v22, 8388608  ;;  %v1375_v14 = vld [vmem:[%s2770_s23 + $0xa8] sm:$0xff] }
 0x16e   : > { %2020 = vmatpush2.msk.msra.mxu0 %vm1258_vm15, %v381_v17  ;;  %2095 = vmatpush2.msk.msra.mxu1 %vm1258_vm15, %v381_v17 }
 0x16f   : > { %1483 = vmatmul.mubr.f32.vlgmr.msra.gmra.mxu0 %v1386_v23  ;;  %1531 = vmatmul.mubr.f32.vlgmr.msra.gmra.mxu1 %v1402_v25  ;;  %v1360_v25 = vld [vmem:[%s2770_s23 + $0x30] sm:$0xff] }
 0x170   : > { %1488 = vmatprep.mubr.f32.mxu0 %v1389_v27  ;;  %1536 = vmatprep.mubr.f32.mxu1 %v1405_v28  ;;  %v1376_v27 = vld [vmem:[%s2770_s23 + $0xb0] sm:$0xff] }
 0x173   : > { %1489 = vmatmul.mubr.f32.gmra.mxu0 %v1388_v61  ;;  %1537 = vmatmul.mubr.f32.gmra.mxu1 %v1404_v4 }
 0x174   : > { %1494 = vmatprep.mubr.f32.mxu0 %v1391_v20  ;;  %1542 = vmatprep.mubr.f32.mxu1 %v1407_v21  ;;  %v1361_v21 = vld [vmem:[%s2770_s23 + $0x38] sm:$0xff] }
 0x177   : > { %1495 = vmatmul.mubr.f32.gmra.mxu0 %v1390_v6  ;;  %1543 = vmatmul.mubr.f32.gmra.mxu1 %v1406_v41  ;;  %v1377_v6 = vld [vmem:[%s2770_s23 + $0xb8] sm:$0xff] }
 0x178   : > { %1500 = vmatprep.mubr.f32.mxu0 %v1393_v7  ;;  %1548 = vmatprep.mubr.f32.mxu1 %v1409_v19 }
 0x17b   : > { %1501 = vmatmul.mubr.f32.gmra.mxu0 %v1392_v18  ;;  %1549 = vmatmul.mubr.f32.gmra.mxu1 %v1408_v35  ;;  %v1362_v35 = vld [vmem:[%s2770_s23 + $0x40] sm:$0xff] }
 0x17c   : > { %1506 = vmatprep.mubr.f32.mxu0 %v1395_v30  ;;  %1554 = vmatprep.mubr.f32.mxu1 %v1411_v15  ;;  %v1378_v30 = vld [vmem:[%s2770_s23 + $0xc0] sm:$0xff] }
 0x17f   : > { %1507 = vmatmul.mubr.f32.gmra.mxu0 %v1394_v31  ;;  %1555 = vmatmul.mubr.f32.gmra.mxu1 %v1410_v34 }
 0x180   : > { %1512 = vmatprep.mubr.f32.mxu0 %v1397_v37  ;;  %1560 = vmatprep.mubr.f32.mxu1 %v1413_v36  ;;  %v1363_v36 = vld [vmem:[%s2770_s23 + $0x48] sm:$0xff] }
 0x183   : > { %1513 = vmatmul.mubr.f32.gmra.mxu0 %v1396_v8  ;;  %1561 = vmatmul.mubr.f32.gmra.mxu1 %v1412_v24  ;;  %v1379_v8 = vld [vmem:[%s2770_s23 + $0xc8] sm:$0xff] }
 0x184   : > { %1518 = vmatprep.mubr.f32.mxu0 %v1399_v32  ;;  %1566 = vmatprep.mubr.f32.mxu1 %v1415_v33 }
 0x187   : > { %1519 = vmatmul.mubr.f32.gmra.mxu0 %v1398_v1  ;;  %1567 = vmatmul.mubr.f32.gmra.mxu1 %v1414_v38  ;;  %v1364_v38 = vld [vmem:[%s2770_s23 + $0x50] sm:$0xff] }
 0x188   : > { %1524 = vmatprep.mubr.f32.mxu0 %v1401_v39  ;;  %1572 = vmatprep.mubr.f32.mxu1 %v1417_v40  ;;  %v1380_v39 = vld [vmem:[%s2770_s23 + $0xd0] sm:$0xff] }
 0x18b   : > { %1525 = vmatmul.mubr.f32.gmra.mxu0 %v1400_v26  ;;  %1573 = vmatmul.mubr.f32.gmra.mxu1 %v1416_v42 }
 0x22f   : > { %v1484_v45 = vpop.f32.mrf.mxu0  ;;  %v1532_v46 = vpop.f32.mrf.mxu1 }
 0x230   : > { %v1579_v49 = vadd.f32 %v1484_v45, %v1354_v43  ;;  %v1595_v50 = vadd.f32 %v1532_v46, %v1370_v44  ;;  %v1365_v44 = vld [vmem:[%s2770_s23 + $0x58] sm:$0xff] }
 0x231   : > { %v1486_v51 = vpop.f32.mrf.mxu0  ;;  %v1534_v52 = vpop.f32.mrf.mxu1  ;;  %v1381_v45 = vld [vmem:[%s2770_s23 + $0xd8] sm:$0xff] }
 0x232   : > { %1611 = vst [vmem:[%s2770_s23] sm:$0xff] %v1579_v49  ;;  %1627 = vst [vmem:[%s2770_s23 + $0x80] sm:$0xff] %v1595_v50  ;;  %v1580_v55 = vadd.f32 %v1486_v51, %v1355_v47  ;;  %v1596_v56 = vadd.f32 %v1534_v52, %v1371_v48  ;;  %v1366_v50 = vld [vmem:[%s2770_s23 + $0x60] sm:$0xff] }
 0x233   : > { %v1490_v57 = vpop.f32.mrf.mxu0  ;;  %v1538_v58 = vpop.f32.mrf.mxu1  ;;  %v1382_v51 = vld [vmem:[%s2770_s23 + $0xe0] sm:$0xff] }
 0x234   : > { %1612 = vst [vmem:[%s2770_s23 + $0x8] sm:$0xff] %v1580_v55  ;;  %1628 = vst [vmem:[%s2770_s23 + $0x88] sm:$0xff] %v1596_v56  ;;  %v1581_v62 = vadd.f32 %v1490_v57, %v1356_v53  ;;  %v1597_v5 = vadd.f32 %v1538_v58, %v1372_v54  ;;  %v1367_v56 = vld [vmem:[%s2770_s23 + $0x68] sm:$0xff] }
 0x235   : > { %v1492_v63 = vpop.f32.mrf.mxu0  ;;  %v1540_v2 = vpop.f32.mrf.mxu1  ;;  %v1383_v57 = vld [vmem:[%s2770_s23 + $0xe8] sm:$0xff] }
 0x236   : > { %1613 = vst [vmem:[%s2770_s23 + $0x10] sm:$0xff] %v1581_v62  ;;  %1629 = vst [vmem:[%s2770_s23 + $0x90] sm:$0xff] %v1597_v5  ;;  %v1582_v29 = vadd.f32 %v1492_v63, %v1357_v59  ;;  %v1598_v11 = vadd.f32 %v1540_v2, %v1373_v60  ;;  %v1368_v5 = vld [vmem:[%s2770_s23 + $0x70] sm:$0xff] }
 0x237   : > { %v1496_v0 = vpop.f32.mrf.mxu0  ;;  %v1544_v12 = vpop.f32.mrf.mxu1  ;;  %v1384_v63 = vld [vmem:[%s2770_s23 + $0xf0] sm:$0xff] }
 0x238   : > { %1614 = vst [vmem:[%s2770_s23 + $0x18] sm:$0xff] %v1582_v29  ;;  %1630 = vst [vmem:[%s2770_s23 + $0x98] sm:$0xff] %v1598_v11  ;;  %v1583_v16 = vadd.f32 %v1496_v0, %v1358_v9  ;;  %v1599_v17 = vadd.f32 %v1544_v12, %v1374_v10  ;;  %v1369_v11 = vld [vmem:[%s2770_s23 + $0x78] sm:$0xff] }
 0x239   : > { %v1498_v22 = vpop.f32.mrf.mxu0  ;;  %v1546_v23 = vpop.f32.mrf.mxu1  ;;  %v1385_v0 = vld [vmem:[%s2770_s23 + $0xf8] sm:$0xff] }
 0x23a   : > { %1615 = vst [vmem:[%s2770_s23 + $0x20] sm:$0xff] %v1583_v16  ;;  %1631 = vst [vmem:[%s2770_s23 + $0xa0] sm:$0xff] %v1599_v17  ;;  %v1584_v28 = vadd.f32 %v1498_v22, %v1359_v13  ;;  %v1600_v61 = vadd.f32 %v1546_v23, %v1375_v14 }
 0x23b   : > { %v1502_v4 = vpop.f32.mrf.mxu0  ;;  %v1550_v20 = vpop.f32.mrf.mxu1 }
 0x23c   : > { %1616 = vst [vmem:[%s2770_s23 + $0x28] sm:$0xff] %v1584_v28  ;;  %1632 = vst [vmem:[%s2770_s23 + $0xa8] sm:$0xff] %v1600_v61  ;;  %v1585_v41 = vadd.f32 %v1502_v4, %v1360_v25  ;;  %v1601_v7 = vadd.f32 %v1550_v20, %v1376_v27 }
 0x23d   : > { %v1504_v19 = vpop.f32.mrf.mxu0  ;;  %v1552_v18 = vpop.f32.mrf.mxu1 }
 0x23e   : > { %1617 = vst [vmem:[%s2770_s23 + $0x30] sm:$0xff] %v1585_v41  ;;  %1633 = vst [vmem:[%s2770_s23 + $0xb0] sm:$0xff] %v1601_v7  ;;  %v1586_v15 = vadd.f32 %v1504_v19, %v1361_v21  ;;  %v1602_v31 = vadd.f32 %v1552_v18, %v1377_v6 }
 0x23f   : > { %v1508_v34 = vpop.f32.mrf.mxu0  ;;  %v1556_v37 = vpop.f32.mrf.mxu1 }
 0x240   : > { %1618 = vst [vmem:[%s2770_s23 + $0x38] sm:$0xff] %v1586_v15  ;;  %1634 = vst [vmem:[%s2770_s23 + $0xb8] sm:$0xff] %v1602_v31  ;;  %v1587_v24 = vadd.f32 %v1508_v34, %v1362_v35  ;;  %v1603_v32 = vadd.f32 %v1556_v37, %v1378_v30 }
 0x241   : > { %v1510_v33 = vpop.f32.mrf.mxu0  ;;  %v1558_v1 = vpop.f32.mrf.mxu1 }
 0x242   : > { %1619 = vst [vmem:[%s2770_s23 + $0x40] sm:$0xff] %v1587_v24  ;;  %1635 = vst [vmem:[%s2770_s23 + $0xc0] sm:$0xff] %v1603_v32  ;;  %v1588_v40 = vadd.f32 %v1510_v33, %v1363_v36  ;;  %v1604_v26 = vadd.f32 %v1558_v1, %v1379_v8 }
 0x243   : > { %v1514_v42 = vpop.f32.mrf.mxu0  ;;  %v1562_v43 = vpop.f32.mrf.mxu1 }
 0x244   : > { %1620 = vst [vmem:[%s2770_s23 + $0x48] sm:$0xff] %v1588_v40  ;;  %1636 = vst [vmem:[%s2770_s23 + $0xc8] sm:$0xff] %v1604_v26  ;;  %v1589_v46 = vadd.f32 %v1514_v42, %v1364_v38  ;;  %v1605_v47 = vadd.f32 %v1562_v43, %v1380_v39 }
 0x245   : > { %v1516_v48 = vpop.f32.mrf.mxu0  ;;  %v1564_v49 = vpop.f32.mrf.mxu1 }
 0x246   : > { %1621 = vst [vmem:[%s2770_s23 + $0x50] sm:$0xff] %v1589_v46  ;;  %1637 = vst [vmem:[%s2770_s23 + $0xd0] sm:$0xff] %v1605_v47  ;;  %v1590_v52 = vadd.f32 %v1516_v48, %v1365_v44  ;;  %v1606_v53 = vadd.f32 %v1564_v49, %v1381_v45 }
 0x247   : > { %v1520_v54 = vpop.f32.mrf.mxu0  ;;  %v1568_v55 = vpop.f32.mrf.mxu1 }
 0x248   : > { %1622 = vst [vmem:[%s2770_s23 + $0x58] sm:$0xff] %v1590_v52  ;;  %1638 = vst [vmem:[%s2770_s23 + $0xd8] sm:$0xff] %v1606_v53  ;;  %v1591_v58 = vadd.f32 %v1520_v54, %v1366_v50  ;;  %v1607_v59 = vadd.f32 %v1568_v55, %v1382_v51 }
 0x249   : > { %v1522_v60 = vpop.f32.mrf.mxu0  ;;  %v1570_v62 = vpop.f32.mrf.mxu1 }
 0x24a   : > { %1623 = vst [vmem:[%s2770_s23 + $0x60] sm:$0xff] %v1591_v58  ;;  %1639 = vst [vmem:[%s2770_s23 + $0xe0] sm:$0xff] %v1607_v59  ;;  %v1592_v2 = vadd.f32 %v1522_v60, %v1367_v56  ;;  %v1608_v9 = vadd.f32 %v1570_v62, %v1383_v57 }
 0x24b   : > { %v1526_v10 = vpop.f32.mrf.mxu0  ;;  %v1574_v29 = vpop.f32.mrf.mxu1 }
 0x24c   : > { %1624 = vst [vmem:[%s2770_s23 + $0x68] sm:$0xff] %v1592_v2  ;;  %1640 = vst [vmem:[%s2770_s23 + $0xe8] sm:$0xff] %v1608_v9  ;;  %v1593_v12 = vadd.f32 %v1526_v10, %v1368_v5  ;;  %v1609_v13 = vadd.f32 %v1574_v29, %v1384_v63  ;;  %1646 = sbr.rel (%p2021_p0) target bundleno = 616 (0x268), region = 52 }
 0x24d   : > { %v1528_v14 = vpop.f32.mrf.mxu0  ;;  %v1576_v16 = vpop.f32.mrf.mxu1 }
 0x24e   : > { %1625 = vst [vmem:[%s2770_s23 + $0x70] sm:$0xff] %v1593_v12  ;;  %1641 = vst [vmem:[%s2770_s23 + $0xf0] sm:$0xff] %v1609_v13  ;;  %v1594_v17 = vadd.f32 %v1528_v14, %v1369_v11  ;;  %v1610_v22 = vadd.f32 %v1576_v16, %v1385_v0 }
 0x250   : > { %1626 = vst [vmem:[%s2770_s23 + $0x78] sm:$0xff] %v1594_v17  ;;  %1642 = vst [vmem:[%s2770_s23 + $0xf8] sm:$0xff] %v1610_v22 }
 0x251   : > { %v1647_v23 = vld [vmem:[%s2770_s23] sm:$0xff]  ;;  %v1715_v27 = vsub.s32 0, %v2807_v3  ;;  %v1648_v28 = vld [vmem:[%s2770_s23 + $0x8] sm:$0xff]  ;;  %v1719_v61 = vsub.s32 1, %v2807_v3  ;;  %v1649_v21 = vld [vmem:[%s2770_s23 + $0x10] sm:$0xff] }
 0x252   : > { %v1711_v25 = vld [vmem:[%s309_s3] sm:$0x3]  ;;  %v1679_v4 = vmul.f32 2.0, %v1647_v23  ;;  %v1680_v20 = vmul.f32 2.0, %v1648_v28  ;;  %v1650_v6 = vld [vmem:[%s2770_s23 + $0x18] sm:$0xff]  ;;  %v1681_v18 = vmul.f32 2.0, %v1649_v21 }
 0x253   : > { %v1651_v41 = vld [vmem:[%s2770_s23 + $0x20] sm:$0xff]  ;;  %v3358_v7 = vrot.slane %v1711_v25, %v1715_v27  ;;  %v3360_v19 = vrot.slane %v1711_v25, %v1719_v61  ;;  %v1682_v35 = vmul.f32 2.0, %v1650_v6  ;;  %v1652_v30 = vld [vmem:[%s2770_s23 + $0x28] sm:$0xff]  ;;  %v1653_v15 = vld [vmem:[%s2770_s23 + $0x30] sm:$0xff] }
 0x254   : > { %v1654_v31 = vld [vmem:[%s2770_s23 + $0x38] sm:$0xff]  ;;  %v1683_v3 = vmul.f32 2.0, %v1651_v41  ;;  %v1684_v34 = vmul.f32 2.0, %v1652_v30  ;;  %v1685_v37 = vmul.f32 2.0, %v1653_v15  ;;  %v1655_v8 = vld [vmem:[%s2770_s23 + $0x40] sm:$0xff]  ;;  %v1656_v24 = vld [vmem:[%s2770_s23 + $0x48] sm:$0xff] }
 0x255   : > { %v1686_v36 = vmul.f32 2.0, %v1654_v31  ;;  %v1723_v32 = vadd.f32 %v3358_v7, %v1679_v4  ;;  %v1724_v33 = vadd.f32 %v3360_v19, %v1680_v20  ;;  %v1725_v1 = vadd.f32 %v3358_v7, %v1681_v18  ;;  %v1657_v39 = vld [vmem:[%s2770_s23 + $0x50] sm:$0xff]  ;;  %v1658_v40 = vld [vmem:[%s2770_s23 + $0x58] sm:$0xff]  ;;  %v1659_v26 = vld [vmem:[%s2770_s23 + $0x60] sm:$0xff] }
 0x256   : > { %v1726_v38 = vadd.f32 %v3360_v19, %v1682_v35  ;;  %v1727_v42 = vadd.f32 %v3358_v7, %v1683_v3  ;;  %v1728_v43 = vadd.f32 %v3360_v19, %v1684_v34  ;;  %v1729_v44 = vadd.f32 %v3358_v7, %v1685_v37  ;;  %v1660_v46 = vld [vmem:[%s2770_s23 + $0x68] sm:$0xff]  ;;  %v1661_v47 = vld [vmem:[%s2770_s23 + $0x70] sm:$0xff]  ;;  %v1663_v53 = vld [vmem:[%s2770_s23 + $0x80] sm:$0xff] }
 0x257   : > { %v1730_v45 = vadd.f32 %v3360_v19, %v1686_v36  ;;  %v1662_v48 = vld [vmem:[%s2770_s23 + $0x78] sm:$0xff]  ;;  %1755 = vst [vmem:[%s2770_s23] sm:$0xff] %v1723_v32  ;;  %1756 = vst [vmem:[%s2770_s23 + $0x8] sm:$0xff] %v1724_v33  ;;  %v1687_v49 = vmul.f32 2.0, %v1655_v8  ;;  %v1688_v50 = vmul.f32 2.0, %v1656_v24  ;;  %v1689_v51 = vmul.f32 2.0, %v1657_v39  ;;  %v1664_v54 = vld [vmem:[%s2770_s23 + $0x88] sm:$0xff] }
 0x258   : > { %1757 = vst [vmem:[%s2770_s23 + $0x10] sm:$0xff] %v1725_v1  ;;  %1758 = vst [vmem:[%s2770_s23 + $0x18] sm:$0xff] %v1726_v38  ;;  %v1690_v52 = vmul.f32 2.0, %v1658_v40  ;;  %v1691_v55 = vmul.f32 2.0, %v1659_v26  ;;  %v1692_v56 = vmul.f32 2.0, %v1660_v46  ;;  %v1693_v57 = vmul.f32 2.0, %v1661_v47 }
 0x259   : > { %1759 = vst [vmem:[%s2770_s23 + $0x20] sm:$0xff] %v1727_v42  ;;  %1760 = vst [vmem:[%s2770_s23 + $0x28] sm:$0xff] %v1728_v43  ;;  %v1694_v58 = vmul.f32 2.0, %v1662_v48  ;;  %v1665_v59 = vld [vmem:[%s2770_s23 + $0x90] sm:$0xff]  ;;  %v1666_v60 = vld [vmem:[%s2770_s23 + $0x98] sm:$0xff]  ;;  %v1731_v62 = vadd.f32 %v3358_v7, %v1687_v49  ;;  %v1732_v5 = vadd.f32 %v3360_v19, %v1688_v50  ;;  %v1733_v63 = vadd.f32 %v3358_v7, %v1689_v51 }
 0x25a   : > { %1761 = vst [vmem:[%s2770_s23 + $0x30] sm:$0xff] %v1729_v44  ;;  %1762 = vst [vmem:[%s2770_s23 + $0x38] sm:$0xff] %v1730_v45  ;;  %v1734_v2 = vadd.f32 %v3360_v19, %v1690_v52  ;;  %v1667_v9 = vld [vmem:[%s2770_s23 + $0xa0] sm:$0xff]  ;;  %v1668_v10 = vld [vmem:[%s2770_s23 + $0xa8] sm:$0xff]  ;;  %v1735_v11 = vadd.f32 %v3358_v7, %v1691_v55  ;;  %v1736_v0 = vadd.f32 %v3360_v19, %v1692_v56  ;;  %v1695_v17 = vmul.f32 2.0, %v1663_v53 }
 0x25b   : > { %v1669_v29 = vld [vmem:[%s2770_s23 + $0xb0] sm:$0xff]  ;;  %v1737_v12 = vadd.f32 %v3358_v7, %v1693_v57  ;;  %v1738_v13 = vadd.f32 %v3360_v19, %v1694_v58  ;;  %v1670_v14 = vld [vmem:[%s2770_s23 + $0xb8] sm:$0xff]  ;;  %v1671_v16 = vld [vmem:[%s2770_s23 + $0xc0] sm:$0xff]  ;;  %1763 = vst [vmem:[%s2770_s23 + $0x40] sm:$0xff] %v1731_v62  ;;  %v1696_v22 = vmul.f32 2.0, %v1664_v54  ;;  %v1697_v23 = vmul.f32 2.0, %v1665_v59 }
 0x25c   : > { %1764 = vst [vmem:[%s2770_s23 + $0x48] sm:$0xff] %v1732_v5  ;;  %1765 = vst [vmem:[%s2770_s23 + $0x50] sm:$0xff] %v1733_v63  ;;  %v1698_v25 = vmul.f32 2.0, %v1666_v60  ;;  %v1672_v27 = vld [vmem:[%s2770_s23 + $0xc8] sm:$0xff]  ;;  %v1673_v28 = vld [vmem:[%s2770_s23 + $0xd0] sm:$0xff]  ;;  %v1699_v61 = vmul.f32 2.0, %v1667_v9  ;;  %v1739_v18 = vadd.f32 %v3358_v7, %v1695_v17 }
 0x25d   : > { %1766 = vst [vmem:[%s2770_s23 + $0x58] sm:$0xff] %v1734_v2  ;;  %1767 = vst [vmem:[%s2770_s23 + $0x60] sm:$0xff] %v1735_v11  ;;  %v1700_v4 = vmul.f32 2.0, %v1668_v10  ;;  %v1701_v20 = vmul.f32 2.0, %v1669_v29  ;;  %v1702_v21 = vmul.f32 2.0, %v1670_v14  ;;  %v1674_v6 = vld [vmem:[%s2770_s23 + $0xd8] sm:$0xff]  ;;  %v1740_v35 = vadd.f32 %v3360_v19, %v1696_v22 }
 0x25e   : > { %1768 = vst [vmem:[%s2770_s23 + $0x68] sm:$0xff] %v1736_v0  ;;  %1769 = vst [vmem:[%s2770_s23 + $0x70] sm:$0xff] %v1737_v12  ;;  %v1675_v41 = vld [vmem:[%s2770_s23 + $0xe0] sm:$0xff]  ;;  %v1741_v30 = vadd.f32 %v3358_v7, %v1697_v23  ;;  %v1742_v15 = vadd.f32 %v3360_v19, %v1698_v25  ;;  %v1676_v31 = vld [vmem:[%s2770_s23 + $0xe8] sm:$0xff]  ;;  %v1743_v37 = vadd.f32 %v3358_v7, %v1699_v61  ;;  %v1703_v32 = vmul.f32 2.0, %v1671_v16 }
 0x25f   : > { %1770 = vst [vmem:[%s2770_s23 + $0x78] sm:$0xff] %v1738_v13  ;;  %v1677_v3 = vld [vmem:[%s2770_s23 + $0xf0] sm:$0xff]  ;;  %v1678_v34 = vld [vmem:[%s2770_s23 + $0xf8] sm:$0xff]  ;;  %v1744_v36 = vadd.f32 %v3360_v19, %v1700_v4  ;;  %v1745_v8 = vadd.f32 %v3358_v7, %v1701_v20  ;;  %v1746_v24 = vadd.f32 %v3360_v19, %v1702_v21  ;;  %1771 = vst [vmem:[%s2770_s23 + $0x80] sm:$0xff] %v1739_v18  ;;  %v1704_v33 = vmul.f32 2.0, %v1672_v27 }
 0x260   : > { %1772 = vst [vmem:[%s2770_s23 + $0x88] sm:$0xff] %v1740_v35  ;;  %1773 = vst [vmem:[%s2770_s23 + $0x90] sm:$0xff] %v1741_v30  ;;  %v1705_v1 = vmul.f32 2.0, %v1673_v28  ;;  %v1706_v38 = vmul.f32 2.0, %v1674_v6  ;;  %v1707_v39 = vmul.f32 2.0, %v1675_v41  ;;  %v1708_v40 = vmul.f32 2.0, %v1676_v31 }
 0x261   : > { %1774 = vst [vmem:[%s2770_s23 + $0x98] sm:$0xff] %v1742_v15  ;;  %1775 = vst [vmem:[%s2770_s23 + $0xa0] sm:$0xff] %v1743_v37  ;;  %v1709_v26 = vmul.f32 2.0, %v1677_v3  ;;  %v1710_v42 = vmul.f32 2.0, %v1678_v34  ;;  %v1747_v43 = vadd.f32 %v3358_v7, %v1703_v32  ;;  %v1748_v44 = vadd.f32 %v3360_v19, %v1704_v33 }
 0x262   : > { %1776 = vst [vmem:[%s2770_s23 + $0xa8] sm:$0xff] %v1744_v36  ;;  %1777 = vst [vmem:[%s2770_s23 + $0xb0] sm:$0xff] %v1745_v8  ;;  %v1749_v45 = vadd.f32 %v3358_v7, %v1705_v1  ;;  %v1750_v46 = vadd.f32 %v3360_v19, %v1706_v38  ;;  %v1751_v47 = vadd.f32 %v3358_v7, %v1707_v39 }
 0x263   : > { %1778 = vst [vmem:[%s2770_s23 + $0xb8] sm:$0xff] %v1746_v24  ;;  %v1752_v48 = vadd.f32 %v3360_v19, %v1708_v40  ;;  %v1753_v49 = vadd.f32 %v3358_v7, %v1709_v26  ;;  %v1754_v50 = vadd.f32 %v3360_v19, %v1710_v42  ;;  %1779 = vst [vmem:[%s2770_s23 + $0xc0] sm:$0xff] %v1747_v43 }
 0x264   : > { %1780 = vst [vmem:[%s2770_s23 + $0xc8] sm:$0xff] %v1748_v44  ;;  %1781 = vst [vmem:[%s2770_s23 + $0xd0] sm:$0xff] %v1749_v45 }
 0x265   : > { %1782 = vst [vmem:[%s2770_s23 + $0xd8] sm:$0xff] %v1750_v46  ;;  %1783 = vst [vmem:[%s2770_s23 + $0xe0] sm:$0xff] %v1751_v47 }
 0x266   : > { %1784 = vst [vmem:[%s2770_s23 + $0xe8] sm:$0xff] %v1752_v48  ;;  %1785 = vst [vmem:[%s2770_s23 + $0xf0] sm:$0xff] %v1753_v49 }
 0x267   : > { %1786 = vst [vmem:[%s2770_s23 + $0xf8] sm:$0xff] %v1754_v50 }
 0x268 PF: > { %s3637_s11 = sld [smem:[#allocation15_spill]]  ;;  %s1804_s9 = sshll.u32 %s2770_s23, 4  ;;  %s3456_s9 = int_to_ptr.vmem [resolvable:$true] %s1804_s9 }
 0x269   : > { %s3638_s1 = sld [smem:[#allocation25_spill]]  ;;  %s3465_s13 = scalar_lea.sflag [#allocation5], %s299_s12 }
 0x26a   : > { %s2306_s30 = scalar_lea.vmem %s3456_s9, 4096 }
 0x26b   : > { %p2307_p10 = scmp.ne.s32.totalorder %s3456_s9, %s2306_s30 }
 0x26d   : > { %p2308_p3 = pnand %p2307_p10, %p2700_p2 }
 0x26e   : > { %s2031_s8 = sshll.u32 %s3637_s11, 6 }
 0x26f   : > { %s1801_s14 = sadd.s32 %s2031_s8, %s2758_s15  ;;  %p2309_p5 = pneg %p2308_p3 }
 0x270   : > { %s2026_s3 = sshll.u32 %s1801_s14, 7  ;;  %s2478_s15 = smov [#allocation8]  }
 0x271   : > { %s3461_s29 = scalar_lea.hbm %s3638_s1, %s2026_s3  ;;  %s2310_s23 = sshll.u32 %s2478_s15, 4  ;;  %s2311_s23 = int_to_ptr.vmem [resolvable:$false] %s2310_s23 }
 0x272   : > { %s2312_s10 = scalar_lea.vmem %s2311_s23, 8192  ;;  %p2313_p4 = scmp.lt.s32.totalorder %s3456_s9, %s2311_s23 }
 0x273   : > { %p2314_p11 = scmp.lt.s32.totalorder %s2312_s10, %s2306_s30 }
 0x275   : > { %p2315_p1 = por %p2314_p11, %p2313_p4 }
 0x277   : > { %p2316_p12 = pnand %p2315_p1, %p2309_p5 }
 0x279   : > { %2319 = shalt.err (!%p2316_p12)
}
 0x27a   : > { %s2320_s12 = scalar_lea.hbm %s3461_s29, 4096  ;;  %s2324_s4 = scalar_lea.hbm %s3638_s1, 16384 }
 0x27b   : > { %p2321_p9 = scmp.ne.s32.totalorder %s3461_s29, %s2320_s12  ;;  %p2325_p8 = scmp.lt.s32.totalorder %s3461_s29, %s3638_s1 }
 0x27c   : > { %p2326_p0 = scmp.lt.s32.totalorder %s2324_s4, %s2320_s12 }
 0x27d   : > { %p2322_p6 = pnand %p2321_p9, %p2700_p2 }
 0x27e   : > { %p2327_p10 = por %p2326_p0, %p2325_p8 }
 0x27f   : > { %p2323_p7 = pneg %p2322_p6 }
 0x281   : > { %p2328_p3 = pnand %p2327_p10, %p2323_p7 }
 0x283   : > { %2331 = shalt.err (!%p2328_p3)
}
 0x284   : > { %s2479_s14 = smov 256   ;;  %s2480_s3 = smov 512  }
 0x285   : > { %s2481_s0 = smov 16  }
 0x286   : > { %2100 = dma.vmem_to_hbm [thread:$0]  (%p2700_p2), %s3456_s9, 4096, %s3461_s29, %s3465_s13, %s2479_s14, %s2480_s3, %s2481_s0  }
 0x287 PF: > { %p2114_p5 = scmp.ge.s32.totalorder %s2470_s5, 2  ;;  %s1819_s20 = sand.u32 1, %s2410_s17  }
 0x288   : > { %s1820_s30 = scalar_lea.sflag [#allocation5], %s1819_s20 }
 0x289   : > { %p2110_p4 = pnand %p2114_p5, %p2715_p13 }
 0x28b   : > { %p2111_p11 = pneg %p2110_p4 }
 0x28d   : > { %2405 = dma.done.wait (%p2111_p11), %s1820_s30, 4096  }
 0x28e   : > { %2407 = vsyncadd (%p2111_p11), %s1820_s30, 4294963200  ;;  %s24_s5 = sadd.s32 1, %s2470_s5   ;;  %s3640_s23 = sld [smem:[#allocation12_spill]] }
 0x28f   : > { %p3493_p1 = scmp.ge.s32.totalorder %s24_s5, 10   ;;  %s3641_s7 = sld [smem:[#allocation16_spill]] }
 0x290   : > { %s3642_s6 = sld [smem:[#allocation17_spill]]  ;;  %s3646_s17 = smov %s2414_s18 }
 0x291   : > { %s3643_s9 = sld [smem:[#allocation18_spill]]  ;;  %s3647_s18 = smov %s2418_s19 }
 0x292   : > { %s3644_s29 = sld [smem:[#allocation20_spill]]  ;;  %s3648_s19 = smov %s2713_s26 }
 0x293   : > { %s3645_s30 = sld [smem:[#allocation21_spill]]  ;;  %s3649_s20 = smov %s2426_s21 }
 0x294   : > { %s3650_s21 = smov %s2430_s22  ;;  %s3651_s22 = smov %s2694_s27 }
 0x295   : > { %s3652_s0 = smov %s2442_s24  ;;  %s3653_s24 = smov %s2710_s25 }
 0x296   : > { %s3654_s25 = smov %s2458_s28  ;;  %s3655_s26 = smov %s3641_s7 }
 0x297   : > { %s3656_s27 = smov %s3642_s6  ;;  %s3657_s28 = smov %s3643_s9 }
 0x298   :  { %23 = sbr.rel (!%p3493_p1) target bundleno = 19 (0x13), region = 105 }
 0x29d   :  { %1825 = vsyncpa [#allocation4], 1 }
 0x29e   :  { %1827 = vsyncpa [#allocation4 + $0x1], 1 }
 0x29f   :  { %1828 = vsyncpa [#allocation7], 1 }
 0x2a0   :  { %1830 = vsyncpa [#allocation7 + $0x1], 1 }
 0x2a1   :  { %1831 = vsyncpa [#allocation5], 1 }
 0x2a2   :  { %1833 = vsyncpa [#allocation5 + $0x1], 1 }

</bundles_post_ra>
